<compile_context>
chip_gen: v7x
topology: tpu7x:2x2x1
jax: 0.10.0
libtpu: 0.0.40
codegen_flags: <defaults>
</compile_context>

<pallas_src>
import functools

import jax
import jax.numpy as jnp
from jax import lax
from jax.experimental import pallas as pl
from jax.experimental.pallas import tpu as pltpu


def attention_layer_kernel(qin_ref, x_ref, k_ref, v_ref,
                           wq_ref, bq_ref, wo_ref, bo_ref, gamma_ref, beta_ref,
                           out_ref, attn_ref, acc_ref, *, eps):
    h = pl.program_id(2)
    num_heads = pl.num_programs(2)

    @pl.when(h == 0)
    def _():
        acc_ref[...] = jnp.zeros_like(acc_ref)

    # Q projection for this head (1/sqrt(dh) pre-folded into Wq/bq).
    # q_in is bf16, weights bf16, accumulate f32 on the MXU.
    q = jnp.dot(qin_ref[0], wq_ref[h],
                preferred_element_type=jnp.float32) + bq_ref[h]      # (block_n, dh)

    k = k_ref[0, 0]   # (M, dh) bf16, precomputed in the wrapper
    v = v_ref[0, 0]   # (M, dh) bf16, precomputed in the wrapper

    # scores = q @ k.T without materializing a transpose (contract on dh).
    s = lax.dot_general(q.astype(jnp.bfloat16), k,
                        dimension_numbers=(((1,), (1,)), ((), ())),
                        preferred_element_type=jnp.float32)          # (block_n, M)

    # TODO(synk): optional key_weights / key_masks / attention_factors /
    # attention_masks inputs (all default None in the PyTorch forward) and the
    # (identity) dropout layer are not wired in.
    s = s - jnp.max(s, axis=-1, keepdims=True)
    e = jnp.exp(s)
    # Exact reciprocal of the (block_n, 1) denominator: negligible cost and the
    # exported attention rows sum to 1 (matches PyTorch softmax exactly in f32).
    inv = 1.0 / jnp.sum(e, axis=-1, keepdims=True)
    p = e * inv
    attn_ref[0, 0] = p.astype(attn_ref.dtype)

    head_out = jnp.dot(p.astype(jnp.bfloat16), v,
                       preferred_element_type=jnp.float32)           # (block_n, dh)
    # Fold the output projection into the head axis: accumulate per-head slab.
    acc_ref[...] += jnp.dot(head_out.astype(jnp.bfloat16), wo_ref[h],
                            preferred_element_type=jnp.float32)      # (block_n, C)

    @pl.when(h == num_heads - 1)
    def _():
        y = acc_ref[...] + bo_ref[...] + x_ref[0]
        mean = jnp.mean(y, axis=-1, keepdims=True)
        var = jnp.mean((y - mean) ** 2, axis=-1, keepdims=True)
        y_norm = (y - mean) * lax.rsqrt(var + eps)
        out_ref[0] = (y_norm * gamma_ref[...] + beta_ref[...]).astype(out_ref.dtype)


def _pick_block_n(n, m):
    # Prefer large query tiles (amortize ~0.35us/step fixed overhead) while
    # keeping the f32 (block_n, M) score block + its writeback buffers bounded.
    for cand in (512, 256, 128):
        if n >= cand and n % cand == 0 and 3 * cand * max(m, 128) * 4 <= (12 << 20):
            return cand
    return n


def attention_layer(input_states, memory_states, input_pos, memory_pos, params,
                    *, num_heads, eps=1e-5, block_n=None, attn_dtype=jnp.float32):
    B, N, C = input_states.shape
    _, M, _ = memory_states.shape
    H = num_heads
    assert C % H == 0, "`d_model` must be a multiple of `num_heads`"
    dh = C // H
    scale = 1.0 / (dh ** 0.5)

    if block_n is None:
        block_n = _pick_block_n(N, M)
    assert N % block_n == 0

    f32, bf16 = jnp.float32, jnp.bfloat16

    # ---- one-time XLA precompute (per review): K/V projections + positional adds.
    q_in = (input_states + input_pos).astype(bf16)                         # (B, N, C)
    k_full = (memory_states + memory_pos) @ params["wk"] + params["bk"]    # (B, M, C) f32
    v_full = memory_states @ params["wv"] + params["bv"]                   # (B, M, C) f32
    k_heads = k_full.reshape(B, M, H, dh).transpose(0, 2, 1, 3).astype(bf16)  # (B,H,M,dh)
    v_heads = v_full.reshape(B, M, H, dh).transpose(0, 2, 1, 3).astype(bf16)  # (B,H,M,dh)

    # Per-head Q / output-proj weights, resident in VMEM; scale folded into Wq/bq.
    wq_h = (params["wq"] * scale).reshape(C, H, dh).transpose(1, 0, 2).astype(bf16)  # (H,C,dh)
    bq_h = (params["bq"] * scale).reshape(H, dh)[:, None, :].astype(f32)             # (H,1,dh)
    wo_h = params["wo"].reshape(H, dh, C).astype(bf16)                                # (H,dh,C)
    bo = params["bo"].astype(f32)
    gamma = params["gamma"].astype(f32)
    beta = params["beta"].astype(f32)
    x_res = input_states.astype(f32)

    kern = functools.partial(attention_layer_kernel, eps=eps)

    qin_spec = pl.BlockSpec((1, block_n, C), lambda b, n, h: (b, n, 0))
    x_spec = pl.BlockSpec((1, block_n, C), lambda b, n, h: (b, n, 0))
    kv_spec = pl.BlockSpec((1, 1, M, dh), lambda b, n, h: (b, h, 0, 0))
    # Resident weights: full tensors, constant block index, single-buffered.
    wq_spec = pl.BlockSpec((H, C, dh), lambda b, n, h: (0, 0, 0),
                           pipeline_mode=pl.Buffered(1))
    bq_spec = pl.BlockSpec((H, 1, dh), lambda b, n, h: (0, 0, 0),
                           pipeline_mode=pl.Buffered(1))
    wo_spec = pl.BlockSpec((H, dh, C), lambda b, n, h: (0, 0, 0),
                           pipeline_mode=pl.Buffered(1))
    vec_spec = pl.BlockSpec((1, C), lambda b, n, h: (0, 0),
                            pipeline_mode=pl.Buffered(1))

    out_spec = pl.BlockSpec((1, block_n, C), lambda b, n, h: (b, n, 0))
    attn_spec = pl.BlockSpec((1, 1, block_n, M), lambda b, n, h: (b, h, n, 0))

    attn_bytes = jnp.dtype(attn_dtype).itemsize
    est = (2 * block_n * C * 2            # q_in block (bf16, double-buffered)
           + 2 * block_n * C * 4          # x block (f32)
           + 2 * 2 * M * dh * 2           # k, v per-head blocks (bf16)
           + 2 * C * C * 2                # resident Wq + Wo (bf16, single buffer)
           + H * dh * 4 + 3 * C * 4       # bq + bo/gamma/beta
           + 2 * block_n * C * 4          # output block
           + 2 * block_n * M * attn_bytes # attention-score block
           + block_n * C * 4)             # accumulator scratch
    try:
        vmem_cap = int(pltpu.get_tpu_info().vmem_capacity_bytes)
    except Exception:
        vmem_cap = 64 << 20               # v7x per-core size: most conservative
    vmem_limit = int(min(max(2 * est, 8 << 20), (vmem_cap * 3) // 4))

    out_states, attn = pl.pallas_call(
        kern,
        grid=(B, N // block_n, H),
        in_specs=[
            qin_spec, x_spec,                 # q_in (bf16), x residual (f32)
            kv_spec, kv_spec,                 # K, V per (b, h) (bf16)
            wq_spec, bq_spec,                 # Wq, bq (resident, per-head indexed)
            wo_spec, vec_spec,                # Wo (resident), bo
            vec_spec, vec_spec,               # gamma, beta
        ],
        out_specs=[out_spec, attn_spec],
        out_shape=[
            jax.ShapeDtypeStruct((B, N, C), jnp.float32),
            jax.ShapeDtypeStruct((B, H, N, M), attn_dtype),
        ],
        scratch_shapes=[pltpu.VMEM((block_n, C), jnp.float32)],
        compiler_params=pltpu.CompilerParams(
            dimension_semantics=("parallel", "parallel", "arbitrary"),
            vmem_limit_bytes=vmem_limit),
    )(
        q_in, x_res, k_heads, v_heads,
        wq_h, bq_h, wo_h, bo, gamma, beta,
    )
    return out_states, attn


def attention_layer_ref(x, mem, pos_q, pos_k, params, *, num_heads, eps=1e-5):
    """Pure-JAX (f32) reference mirroring the PyTorch forward."""
    B, N, C = x.shape
    M = mem.shape[1]
    dh = C // num_heads
    q = (x + pos_q) @ params["wq"] + params["bq"]
    k = (mem + pos_k) @ params["wk"] + params["bk"]
    v = mem @ params["wv"] + params["bv"]
    q = q.reshape(B, N, num_heads, dh).transpose(0, 2, 1, 3)
    k = k.reshape(B, M, num_heads, dh).transpose(0, 2, 1, 3)
    v = v.reshape(B, M, num_heads, dh).transpose(0, 2, 1, 3)
    scores = jnp.einsum("bhnc,bhmc->bhnm", q, k) / (dh ** 0.5)
    attn = jax.nn.softmax(scores, axis=-1)
    hidden = jnp.einsum("bhnm,bhmc->bhnc", attn, v)
    hidden = hidden.transpose(0, 2, 1, 3).reshape(B, N, C)
    hidden = hidden @ params["wo"] + params["bo"]
    y = hidden + x
    mean = jnp.mean(y, axis=-1, keepdims=True)
    var = jnp.mean((y - mean) ** 2, axis=-1, keepdims=True)
    out = (y - mean) / jnp.sqrt(var + eps) * params["gamma"] + params["beta"]
    return out, attn


if __name__ == "__main__":
    # dh = 32; C and M are multiples of 128 so out / attn stores are lane-dense,
    # and B * (N // block_n) = 2 (even) for v7x megacore balance.
    B, N, M, C, H = 2, 128, 256, 128, 4

    key = jax.random.PRNGKey(0)
    ks = jax.random.split(key, 16)

    input_states = jax.random.normal(ks[0], (B, N, C), jnp.float32)
    memory_states = jax.random.normal(ks[1], (B, M, C), jnp.float32)
    input_pos = jax.random.normal(ks[2], (B, N, C), jnp.float32)
    memory_pos = jax.random.normal(ks[3], (B, M, C), jnp.float32)

    def lin(kw, kb):
        # synthetic weights, stored in "x @ W + b" orientation
        return (0.1 * jax.random.normal(kw, (C, C), jnp.float32),
                0.1 * jax.random.normal(kb, (1, C), jnp.float32))

    wq, bq = lin(ks[4], ks[5])
    wk, bk = lin(ks[6], ks[7])
    wv, bv = lin(ks[8], ks[9])
    wo, bo = lin(ks[10], ks[11])
    params = dict(wq=wq, bq=bq, wk=wk, bk=bk, wv=wv, bv=bv, wo=wo, bo=bo,
                  gamma=1.0 + 0.1 * jax.random.normal(ks[12], (1, C), jnp.float32),
                  beta=0.1 * jax.random.normal(ks[13], (1, C), jnp.float32))

    out, attn = attention_layer(input_states, memory_states, input_pos, memory_pos,
                                params, num_heads=H)
    jax.block_until_ready(out)
    jax.block_until_ready(attn)

    out_expected, attn_expected = attention_layer_ref(
        input_states, memory_states, input_pos, memory_pos, params, num_heads=H)

    # bf16 MXU operands (f32 accumulation) -> slightly looser tolerances than pure f32.
    assert jnp.allclose(attn, attn_expected, atol=2e-2, rtol=2e-2), \
        float(jnp.max(jnp.abs(attn - attn_expected)))
    assert jnp.allclose(out, out_expected, atol=5e-2, rtol=5e-2), \
        float(jnp.max(jnp.abs(out - out_expected)))

    print("KERNEL_OK")
</pallas_src>

<mosaic_0001>
module attributes {stable_mosaic.version = 11 : i64} {
  func.func @attention_layer_kernel(%arg0: i32, %arg1: i32, %arg2: i32, %arg3: memref<1x128x128xbf16, #tpu.memory_space<vmem>>, %arg4: memref<1x128x128xf32, #tpu.memory_space<vmem>>, %arg5: memref<1x1x256x32xbf16, #tpu.memory_space<vmem>>, %arg6: memref<1x1x256x32xbf16, #tpu.memory_space<vmem>>, %arg7: memref<4x128x32xbf16, #tpu.memory_space<vmem>>, %arg8: memref<4x1x32xf32, #tpu.memory_space<vmem>>, %arg9: memref<4x32x128xbf16, #tpu.memory_space<vmem>>, %arg10: memref<1x128xf32, #tpu.memory_space<vmem>>, %arg11: memref<1x128xf32, #tpu.memory_space<vmem>>, %arg12: memref<1x128xf32, #tpu.memory_space<vmem>>, %arg13: memref<1x128x128xf32, #tpu.memory_space<vmem>>, %arg14: memref<1x1x128x256xf32, #tpu.memory_space<vmem>>, %arg15: memref<128x128xf32, #tpu.memory_space<vmem>>) attributes {dimension_semantics = [#tpu.dimension_semantics<parallel>, #tpu.dimension_semantics<parallel>, #tpu.dimension_semantics<arbitrary>], iteration_bounds = array<i64: 2, 1, 4>, scalar_prefetch = 0 : i64, scratch_operands = 1 : i64, tpu.core_type = #tpu.core_type<tc>, window_params = [{transform_indices = @transform_0, window_bounds = array<i64: 1, 128, 128>}, {transform_indices = @transform_1, window_bounds = array<i64: 1, 128, 128>}, {transform_indices = @transform_2, window_bounds = array<i64: 1, 1, 256, 32>}, {transform_indices = @transform_3, window_bounds = array<i64: 1, 1, 256, 32>}, {pipeline_mode = #tpu.pipeline_mode<synchronous>, transform_indices = @transform_4, window_bounds = array<i64: 4, 128, 32>}, {pipeline_mode = #tpu.pipeline_mode<synchronous>, transform_indices = @transform_5, window_bounds = array<i64: 4, 1, 32>}, {pipeline_mode = #tpu.pipeline_mode<synchronous>, transform_indices = @transform_6, window_bounds = array<i64: 4, 32, 128>}, {pipeline_mode = #tpu.pipeline_mode<synchronous>, transform_indices = @transform_7, window_bounds = array<i64: 1, 128>}, {pipeline_mode = #tpu.pipeline_mode<synchronous>, transform_indices = @transform_8, window_bounds = array<i64: 1, 128>}, {pipeline_mode = #tpu.pipeline_mode<synchronous>, transform_indices = @transform_9, window_bounds = array<i64: 1, 128>}, {transform_indices = @transform_10, window_bounds = array<i64: 1, 128, 128>}, {transform_indices = @transform_11, window_bounds = array<i64: 1, 1, 128, 256>}]} {
    %c0_i32 = arith.constant 0 : i32
    %0 = arith.cmpi eq, %arg2, %c0_i32 : i32
    %1 = arith.extui %0 : i1 to i32
    %c0_i32_0 = arith.constant 0 : i32
    %2 = arith.cmpi ne, %1, %c0_i32_0 : i32
    scf.if %2 {
      %cst_32 = arith.constant 0.000000e+00 : f32
      %47 = vector.broadcast %cst_32 : f32 to vector<128x128xf32>
      %c0_33 = arith.constant 0 : index
      %c0_34 = arith.constant 0 : index
      %48 = vector.load %arg15[%c0_33, %c0_34] : memref<128x128xf32, #tpu.memory_space<vmem>>, vector<128x128xf32>
      tpu.vector_store %arg15[%c0_33, %c0_34], %47 {strides = array<i32>} : memref<128x128xf32, #tpu.memory_space<vmem>>, vector<128x128xf32>,
    } else {
    }
    %c0 = arith.constant 0 : index
    %c0_1 = arith.constant 0 : index
    %c0_2 = arith.constant 0 : index
    %3 = vector.load %arg3[%c0, %c0_1, %c0_2] : memref<1x128x128xbf16, #tpu.memory_space<vmem>>, vector<1x128x128xbf16>
    %4 = vector.shape_cast %3 : vector<1x128x128xbf16> to vector<128x128xbf16>
    %5 = arith.index_cast %arg2 : i32 to index
    %c0_3 = arith.constant 0 : index
    %c0_4 = arith.constant 0 : index
    %6 = vector.load %arg7[%5, %c0_3, %c0_4] : memref<4x128x32xbf16, #tpu.memory_space<vmem>>, vector<1x128x32xbf16>
    %7 = vector.shape_cast %6 : vector<1x128x32xbf16> to vector<128x32xbf16>
    %cst = arith.constant dense<0.000000e+00> : vector<128x32xf32>
    %8 = tpu.matmul %4, %7, %cst {dimension_numbers = #tpu.dot_dimension_numbers<[1], [0], [0], [1], [0, 0, 1, 1], [], []>} : vector<128x128xbf16>, vector<128x32xbf16>, vector<128x32xf32> -> vector<128x32xf32>
    %9 = arith.index_cast %arg2 : i32 to index
    %c0_5 = arith.constant 0 : index
    %c0_6 = arith.constant 0 : index
    %10 = vector.load %arg8[%9, %c0_5, %c0_6] : memref<4x1x32xf32, #tpu.memory_space<vmem>>, vector<1x1x32xf32>
    %11 = vector.shape_cast %10 : vector<1x1x32xf32> to vector<1x32xf32>
    %12 = vector.broadcast %11 : vector<1x32xf32> to vector<128x32xf32>
    %13 = arith.addf %8, %12 : vector<128x32xf32>
    %c0_7 = arith.constant 0 : index
    %c0_8 = arith.constant 0 : index
    %c0_9 = arith.constant 0 : index
    %c0_10 = arith.constant 0 : index
    %14 = vector.load %arg5[%c0_7, %c0_8, %c0_9, %c0_10] : memref<1x1x256x32xbf16, #tpu.memory_space<vmem>>, vector<1x1x256x32xbf16>
    %15 = vector.shape_cast %14 : vector<1x1x256x32xbf16> to vector<256x32xbf16>
    %c0_11 = arith.constant 0 : index
    %c0_12 = arith.constant 0 : index
    %c0_13 = arith.constant 0 : index
    %c0_14 = arith.constant 0 : index
    %16 = vector.load %arg6[%c0_11, %c0_12, %c0_13, %c0_14] : memref<1x1x256x32xbf16, #tpu.memory_space<vmem>>, vector<1x1x256x32xbf16>
    %17 = vector.shape_cast %16 : vector<1x1x256x32xbf16> to vector<256x32xbf16>
    %18 = arith.truncf %13 : vector<128x32xf32> to vector<128x32xbf16>
    %cst_15 = arith.constant dense<0.000000e+00> : vector<128x256xf32>
    %19 = tpu.matmul %18, %15, %cst_15 {dimension_numbers = #tpu.dot_dimension_numbers<[1], [1], [0], [0], [0, 0, 1, 0], [], []>} : vector<128x32xbf16>, vector<256x32xbf16>, vector<128x256xf32> -> vector<128x256xf32>
    %cst_16 = arith.constant dense<0xFF800000> : vector<128xf32>
    %20 = vector.multi_reduction <maximumf>, %19, %cst_16 [1] : vector<128x256xf32> to vector<128xf32>
    %21 = vector.shape_cast %20 : vector<128xf32> to vector<128x1xf32>
    %22 = vector.broadcast %21 : vector<128x1xf32> to vector<128x256xf32>
    %23 = arith.subf %19, %22 : vector<128x256xf32>
    %24 = math.exp %23 : vector<128x256xf32>
    %cst_17 = arith.constant dense<0.000000e+00> : vector<128xf32>
    %25 = vector.multi_reduction <add>, %24, %cst_17 [1] : vector<128x256xf32> to vector<128xf32>
    %26 = vector.shape_cast %25 : vector<128xf32> to vector<128x1xf32>
    %cst_18 = arith.constant 1.000000e+00 : f32
    %27 = vector.broadcast %cst_18 : f32 to vector<128x1xf32>
    %28 = arith.divf %27, %26 : vector<128x1xf32>
    %29 = vector.broadcast %28 : vector<128x1xf32> to vector<128x256xf32>
    %30 = arith.mulf %24, %29 : vector<128x256xf32>
    %c0_19 = arith.constant 0 : index
    %c0_20 = arith.constant 0 : index
    %c0_21 = arith.constant 0 : index
    %c0_22 = arith.constant 0 : index
    %31 = vector.load %arg14[%c0_19, %c0_20, %c0_21, %c0_22] : memref<1x1x128x256xf32, #tpu.memory_space<vmem>>, vector<1x1x128x256xf32>
    %32 = vector.shape_cast %31 : vector<1x1x128x256xf32> to vector<128x256xf32>
    %33 = vector.shape_cast %30 : vector<128x256xf32> to vector<1x1x128x256xf32>
    tpu.vector_store %arg14[%c0_19, %c0_20, %c0_21, %c0_22], %33 {strides = array<i32>} : memref<1x1x128x256xf32, #tpu.memory_space<vmem>>, vector<1x1x128x256xf32>,
    %34 = arith.truncf %30 : vector<128x256xf32> to vector<128x256xbf16>
    %cst_23 = arith.constant dense<0.000000e+00> : vector<128x32xf32>
    %35 = tpu.matmul %34, %17, %cst_23 {dimension_numbers = #tpu.dot_dimension_numbers<[1], [0], [0], [1], [0, 0, 1, 1], [], []>} : vector<128x256xbf16>, vector<256x32xbf16>, vector<128x32xf32> -> vector<128x32xf32>
    %c0_24 = arith.constant 0 : index
    %c0_25 = arith.constant 0 : index
    %36 = vector.load %arg15[%c0_24, %c0_25] : memref<128x128xf32, #tpu.memory_space<vmem>>, vector<128x128xf32>
    %37 = arith.truncf %35 : vector<128x32xf32> to vector<128x32xbf16>
    %38 = arith.index_cast %arg2 : i32 to index
    %c0_26 = arith.constant 0 : index
    %c0_27 = arith.constant 0 : index
    %39 = vector.load %arg9[%38, %c0_26, %c0_27] : memref<4x32x128xbf16, #tpu.memory_space<vmem>>, vector<1x32x128xbf16>
    %40 = vector.shape_cast %39 : vector<1x32x128xbf16> to vector<32x128xbf16>
    %cst_28 = arith.constant dense<0.000000e+00> : vector<128x128xf32>
    %41 = tpu.matmul %37, %40, %cst_28 {dimension_numbers = #tpu.dot_dimension_numbers<[1], [0], [0], [1], [0, 0, 1, 1], [], []>} : vector<128x32xbf16>, vector<32x128xbf16>, vector<128x128xf32> -> vector<128x128xf32>
    %42 = arith.addf %36, %41 : vector<128x128xf32>
    %c0_29 = arith.constant 0 : index
    %c0_30 = arith.constant 0 : index
    %43 = vector.load %arg15[%c0_29, %c0_30] : memref<128x128xf32, #tpu.memory_space<vmem>>, vector<128x128xf32>
    tpu.vector_store %arg15[%c0_29, %c0_30], %42 {strides = array<i32>} : memref<128x128xf32, #tpu.memory_space<vmem>>, vector<128x128xf32>,
    %c3_i32 = arith.constant 3 : i32
    %44 = arith.cmpi eq, %arg2, %c3_i32 : i32
    %45 = arith.extui %44 : i1 to i32
    %c0_i32_31 = arith.constant 0 : i32
    %46 = arith.cmpi ne, %45, %c0_i32_31 : i32
    scf.if %46 {
      %c0_32 = arith.constant 0 : index
      %c0_33 = arith.constant 0 : index
      %47 = vector.load %arg15[%c0_32, %c0_33] : memref<128x128xf32, #tpu.memory_space<vmem>>, vector<128x128xf32>
      %c0_34 = arith.constant 0 : index
      %c0_35 = arith.constant 0 : index
      %48 = vector.load %arg10[%c0_34, %c0_35] : memref<1x128xf32, #tpu.memory_space<vmem>>, vector<1x128xf32>
      %49 = vector.broadcast %48 : vector<1x128xf32> to vector<128x128xf32>
      %50 = arith.addf %47, %49 : vector<128x128xf32>
      %c0_36 = arith.constant 0 : index
      %c0_37 = arith.constant 0 : index
      %c0_38 = arith.constant 0 : index
      %51 = vector.load %arg4[%c0_36, %c0_37, %c0_38] : memref<1x128x128xf32, #tpu.memory_space<vmem>>, vector<1x128x128xf32>
      %52 = vector.shape_cast %51 : vector<1x128x128xf32> to vector<128x128xf32>
      %53 = arith.addf %50, %52 : vector<128x128xf32>
      %cst_39 = arith.constant dense<0.000000e+00> : vector<128xf32>
      %54 = vector.multi_reduction <add>, %53, %cst_39 [1] : vector<128x128xf32> to vector<128xf32>
      %55 = vector.shape_cast %54 : vector<128xf32> to vector<128x1xf32>
      %cst_40 = arith.constant 1.280000e+02 : f32
      %56 = vector.broadcast %cst_40 : f32 to vector<128x1xf32>
      %57 = arith.divf %55, %56 : vector<128x1xf32>
      %58 = vector.broadcast %57 : vector<128x1xf32> to vector<128x128xf32>
      %59 = arith.subf %53, %58 : vector<128x128xf32>
      %60 = arith.mulf %59, %59 : vector<128x128xf32>
      %cst_41 = arith.constant dense<0.000000e+00> : vector<128xf32>
      %61 = vector.multi_reduction <add>, %60, %cst_41 [1] : vector<128x128xf32> to vector<128xf32>
      %62 = vector.shape_cast %61 : vector<128xf32> to vector<128x1xf32>
      %cst_42 = arith.constant 1.280000e+02 : f32
      %63 = vector.broadcast %cst_42 : f32 to vector<128x1xf32>
      %64 = arith.divf %62, %63 : vector<128x1xf32>
      %65 = vector.broadcast %57 : vector<128x1xf32> to vector<128x128xf32>
      %66 = arith.subf %53, %65 : vector<128x128xf32>
      %cst_43 = arith.constant 9.99999974E-6 : f32
      %67 = vector.broadcast %cst_43 : f32 to vector<128x1xf32>
      %68 = arith.addf %64, %67 : vector<128x1xf32>
      %69 = math.rsqrt %68 : vector<128x1xf32>
      %70 = vector.broadcast %69 : vector<128x1xf32> to vector<128x128xf32>
      %71 = arith.mulf %66, %70 : vector<128x128xf32>
      %c0_44 = arith.constant 0 : index
      %c0_45 = arith.constant 0 : index
      %72 = vector.load %arg11[%c0_44, %c0_45] : memref<1x128xf32, #tpu.memory_space<vmem>>, vector<1x128xf32>
      %73 = vector.broadcast %72 : vector<1x128xf32> to vector<128x128xf32>
      %74 = arith.mulf %71, %73 : vector<128x128xf32>
      %c0_46 = arith.constant 0 : index
      %c0_47 = arith.constant 0 : index
      %75 = vector.load %arg12[%c0_46, %c0_47] : memref<1x128xf32, #tpu.memory_space<vmem>>, vector<1x128xf32>
      %76 = vector.broadcast %75 : vector<1x128xf32> to vector<128x128xf32>
      %77 = arith.addf %74, %76 : vector<128x128xf32>
      %c0_48 = arith.constant 0 : index
      %c0_49 = arith.constant 0 : index
      %c0_50 = arith.constant 0 : index
      %78 = vector.load %arg13[%c0_48, %c0_49, %c0_50] : memref<1x128x128xf32, #tpu.memory_space<vmem>>, vector<1x128x128xf32>
      %79 = vector.shape_cast %78 : vector<1x128x128xf32> to vector<128x128xf32>
      %80 = vector.shape_cast %77 : vector<128x128xf32> to vector<1x128x128xf32>
      tpu.vector_store %arg13[%c0_48, %c0_49, %c0_50], %80 {strides = array<i32>} : memref<1x128x128xf32, #tpu.memory_space<vmem>>, vector<1x128x128xf32>,
    } else {
    }
    return
  }
  func.func @transform_0(%arg0: i32, %arg1: i32, %arg2: i32) -> (i32, i32, i32) {
    %c0_i32 = arith.constant 0 : i32
    %c0_i32_0 = arith.constant 0 : i32
    return %arg0, %arg1, %c0_i32 : i32, i32, i32
  }
  func.func @transform_1(%arg0: i32, %arg1: i32, %arg2: i32) -> (i32, i32, i32) {
    %c0_i32 = arith.constant 0 : i32
    %c0_i32_0 = arith.constant 0 : i32
    return %arg0, %arg1, %c0_i32 : i32, i32, i32
  }
  func.func @transform_2(%arg0: i32, %arg1: i32, %arg2: i32) -> (i32, i32, i32, i32) {
    %c0_i32 = arith.constant 0 : i32
    %c0_i32_0 = arith.constant 0 : i32
    %c0_i32_1 = arith.constant 0 : i32
    return %arg0, %arg2, %c0_i32, %c0_i32_0 : i32, i32, i32, i32
  }
  func.func @transform_3(%arg0: i32, %arg1: i32, %arg2: i32) -> (i32, i32, i32, i32) {
    %c0_i32 = arith.constant 0 : i32
    %c0_i32_0 = arith.constant 0 : i32
    %c0_i32_1 = arith.constant 0 : i32
    return %arg0, %arg2, %c0_i32, %c0_i32_0 : i32, i32, i32, i32
  }
  func.func @transform_4(%arg0: i32, %arg1: i32, %arg2: i32) -> (i32, i32, i32) {
    %c0_i32 = arith.constant 0 : i32
    %c0_i32_0 = arith.constant 0 : i32
    %c0_i32_1 = arith.constant 0 : i32
    %c0_i32_2 = arith.constant 0 : i32
    return %c0_i32, %c0_i32_0, %c0_i32_1 : i32, i32, i32
  }
  func.func @transform_5(%arg0: i32, %arg1: i32, %arg2: i32) -> (i32, i32, i32) {
    %c0_i32 = arith.constant 0 : i32
    %c0_i32_0 = arith.constant 0 : i32
    %c0_i32_1 = arith.constant 0 : i32
    %c0_i32_2 = arith.constant 0 : i32
    return %c0_i32, %c0_i32_0, %c0_i32_1 : i32, i32, i32
  }
  func.func @transform_6(%arg0: i32, %arg1: i32, %arg2: i32) -> (i32, i32, i32) {
    %c0_i32 = arith.constant 0 : i32
    %c0_i32_0 = arith.constant 0 : i32
    %c0_i32_1 = arith.constant 0 : i32
    %c0_i32_2 = arith.constant 0 : i32
    return %c0_i32, %c0_i32_0, %c0_i32_1 : i32, i32, i32
  }
  func.func @transform_7(%arg0: i32, %arg1: i32, %arg2: i32) -> (i32, i32) {
    %c0_i32 = arith.constant 0 : i32
    %c0_i32_0 = arith.constant 0 : i32
    %c0_i32_1 = arith.constant 0 : i32
    return %c0_i32, %c0_i32_0 : i32, i32
  }
  func.func @transform_8(%arg0: i32, %arg1: i32, %arg2: i32) -> (i32, i32) {
    %c0_i32 = arith.constant 0 : i32
    %c0_i32_0 = arith.constant 0 : i32
    %c0_i32_1 = arith.constant 0 : i32
    return %c0_i32, %c0_i32_0 : i32, i32
  }
  func.func @transform_9(%arg0: i32, %arg1: i32, %arg2: i32) -> (i32, i32) {
    %c0_i32 = arith.constant 0 : i32
    %c0_i32_0 = arith.constant 0 : i32
    %c0_i32_1 = arith.constant 0 : i32
    return %c0_i32, %c0_i32_0 : i32, i32
  }
  func.func @transform_10(%arg0: i32, %arg1: i32, %arg2: i32) -> (i32, i32, i32) {
    %c0_i32 = arith.constant 0 : i32
    %c0_i32_0 = arith.constant 0 : i32
    return %arg0, %arg1, %c0_i32 : i32, i32, i32
  }
  func.func @transform_11(%arg0: i32, %arg1: i32, %arg2: i32) -> (i32, i32, i32, i32) {
    %c0_i32 = arith.constant 0 : i32
    %c0_i32_0 = arith.constant 0 : i32
    return %arg0, %arg2, %arg1, %c0_i32 : i32, i32, i32, i32
  }
}

</mosaic_0001>

<bundles_post_ra>
// kernel: tpu_custom_call.1
= control target key start
LH: loop header
LB: loop body
LE: loop exit
PB: predicated region body
PF: predicated region fallthrough
CT: control target
= control target key end

     0   :  { %s4069_s0 = inlined_call_operand.vmem [shape: bf16[2,128,128], index: 0, kind: input, shape index: {}]   ;;  %s4070_s1 = inlined_call_operand.vmem [shape: f32[2,128,128], index: 1, kind: input, shape index: {}]   ;;  %s4071_s2 = inlined_call_operand.vmem [shape: bf16[2,4,256,32], index: 2, kind: input, shape index: {}]   ;;  %s4072_s3 = inlined_call_operand.vmem [shape: bf16[2,4,256,32], index: 3, kind: input, shape index: {}]   ;;  %s4073_s4 = inlined_call_operand.vmem [shape: bf16[4,128,32], index: 4, kind: input, shape index: {}]   ;;  %s4074_s5 = inlined_call_operand.vmem [shape: f32[4,1,32], index: 5, kind: input, shape index: {}]   ;;  %s4075_s6 = inlined_call_operand.vmem [shape: bf16[4,32,128], index: 6, kind: input, shape index: {}]   ;;  %s4076_s7 = inlined_call_operand.vmem [shape: f32[1,128], index: 7, kind: input, shape index: {}]   ;;  %s4077_s8 = inlined_call_operand.vmem [shape: f32[1,128], index: 8, kind: input, shape index: {}]   ;;  %s4078_s9 = inlined_call_operand.vmem [shape: f32[1,128], index: 9, kind: input, shape index: {}]   ;;  %s4079_s10 = inlined_call_operand.hbm [shape: f32[2,128,128], index: 10, kind: output, shape index: {0}]   ;;  %s4080_s11 = inlined_call_operand.hbm [shape: f32[2,4,128,256], index: 11, kind: output, shape index: {1}]  }
   0x1   :  { %4103 = sst [smem:[#allocation26_spill]] %s4069_s0 }
   0x2   :  { %4104 = sst [smem:[#allocation27_spill]] %s4078_s9 }
   0x3   :  { %4105 = sst [smem:[#allocation28_spill]] %s4079_s10 }
   0x4   :  { %4106 = sst [smem:[#allocation29_spill]] %s4080_s11 }
   0x5   :  { %17 = vsyncpa [#allocation4], 0 }
   0x6   :  { %19 = vsyncpa [#allocation4 + $0x1], 0 }
   0x7   :  { %20 = vsyncpa [#allocation6], 0 }
   0x8   :  { %22 = vsyncpa [#allocation6 + $0x1], 0  ;;  %s3181_s17 = smov 0   ;;  %s3183_s18 = smov 0  }
   0x9   :  { %s3185_s19 = smov 0   ;;  %s3187_s20 = smov 0  }
   0xa   :  { %s3189_s21 = smov 0   ;;  %s3191_s22 = smov 0  }
   0xb   :  { %s3193_s23 = smov 0   ;;  %s3195_s24 = smov 0  }
   0xc   :  { %s3197_s25 = smov 0   ;;  %s3199_s26 = smov 0  }
   0xd   :  { %s3201_s27 = smov 0  }
   0xe LB: > { %4107 = sst [smem:[#allocation9_spill]] %s3072_s17  ;;  %s2374_s28 = sadd.s32 4294967295, %s3112_s27   ;;  %s3112_s27 = sphi %s3201_s27, %s28_s27   ;;  %s3108_s26 = sphi %s3199_s26, %s4155_s26   ;;  %s3104_s25 = sphi %s3197_s25, %s4154_s25   ;;  %s3100_s24 = sphi %s3195_s24, %s4153_s24   ;;  %s3096_s23 = sphi %s3193_s23, %s4152_s23   ;;  %s3092_s22 = sphi %s3191_s22, %s4151_s22   ;;  %s3088_s21 = sphi %s3189_s21, %s4150_s21   ;;  %s3084_s20 = sphi %s3187_s20, %s4149_s20   ;;  %s3080_s19 = sphi %s3185_s19, %s4148_s19   ;;  %s3076_s18 = sphi %s3183_s18, %s4147_s18   ;;  %s3072_s17 = sphi %s3181_s17, %s4146_s17  }
   0xf   : > { %4108 = sst [smem:[#allocation10_spill]] %s3076_s18  ;;  %s2375_s29 = sadd.s32 4294967294, %s3112_s27  }
  0x10   : > { %4109 = sst [smem:[#allocation11_spill]] %s3080_s19  ;;  %s40_s30 = sadd.s32 1, %s3104_s25 }
  0x11   : > { %4110 = sst [smem:[#allocation12_spill]] %s3084_s20  ;;  %s47_s12 = sadd.s32 1, %s3108_s26 }
  0x12   : > { %4111 = sst [smem:[#allocation13_spill]] %s3088_s21  ;;  %p41_p0 = scmp.ge.s32.totalorder %s40_s30, 4 }
  0x13   : > { %4112 = sst [smem:[#allocation14_spill]] %s3092_s22  ;;  %s294_s13 = sadd.s32 1, %s3092_s22 }
  0x14   : > { %4113 = sst [smem:[#allocation15_spill]] %s3104_s25  ;;  %p304_p1 = scmp.ne.s32.totalorder %s3092_s22, %s3088_s21 }
  0x15   : > { %4114 = sst [smem:[#allocation16_spill]] %s3108_s26  ;;  %p3243_p2 = scmp.eq.s32.totalorder %s2374_s28, 7 }
  0x16   : > { %4115 = sst [smem:[#allocation17_spill]] %s3112_s27  ;;  %s4157_s30 = smov (%p41_p0, %s40_s30), 0 }
  0x17   : > { %4117 = sst [smem:[#allocation18_spill]] %s4157_s30  ;;  %s4159_s12 = smov (!%p41_p0, %s47_s12), %s3108_s26 }
  0x18   : > { %p3252_p3 = por %p3243_p2, %p304_p1  ;;  %p310_p4 = scmp.ne.s32.totalorder %s3088_s21, %s3084_s20 }
  0x19   : > { %p49_p5 = scmp.ge.s32.totalorder %s4159_s12, 2  ;;  %p3258_p6 = scmp.eq.s32.totalorder %s2375_s29, 7 }
  0x1a   : > { %s4118_s15 = scalar_select %p3252_p3, 1, 0 }
  0x1b   : > { %s318_s28 = ssub.s32 %s3104_s25, %s4157_s30  ;;  %s324_s11 = sadd.s32 1, %s3080_s19 }
  0x1c   : > { %4119 = sst [smem:[#allocation19_spill]] %s4118_s15  ;;  %s4161_s12 = smov (%p49_p5, %s4159_s12), 0 }
  0x1d   : > { %4121 = sst [smem:[#allocation20_spill]] %s4161_s12  ;;  %p3269_p7 = por %p3258_p6, %p310_p4 }
  0x1e   : > { %p334_p8 = scmp.ne.s32.totalorder %s3080_s19, %s3076_s18  ;;  %s289_s20 = ssub.s32 %s3108_s26, %s4161_s12 }
  0x1f   : > { %s4122_s10 = scalar_select %p3269_p7, 1, 0 }
  0x20   : > { %p340_p9 = scmp.ne.s32.totalorder %s3076_s18, %s3072_s17  ;;  %p292_p10 = scmp.eq.s32.totalorder %s289_s20, 0 }
  0x21   : > { %4123 = sst [smem:[#allocation21_spill]] %s4122_s10  ;;  %s319_s29 = sor.u32 %s318_s28, %s289_s20 }
  0x22   : > { %p322_p11 = scmp.eq.s32.totalorder %s319_s29, 0  ;;  %p3281_p12 = por %p334_p8, %p3243_p2 }
  0x23   : > { %s3286_s30 = scalar_select %p292_p10, %s3092_s22, %s294_s13  }
  0x24   : > { %s4124_s15 = scalar_select %p3281_p12, 1, 0 }
  0x25   : > { %4126 = sst [smem:[#allocation23_spill]] %s3286_s30  ;;  %p3293_p13 = por %p340_p9, %p3258_p6 }
  0x26   : > { %4125 = sst [smem:[#allocation22_spill]] %s4124_s15  ;;  %p2378_p0 = scmp.ge.s32.totalorder %s3112_s27, 1 }
  0x27   : > { %s3289_s25 = scalar_select %p322_p11, %s3080_s19, %s324_s11  }
  0x28   : > { %s4128_s9 = scalar_select %p3293_p13, 1, 0 }
  0x29   : > { %4127 = sst [smem:[#allocation24_spill]] %s3289_s25  ;;  %p427_p1 = scmp.lt.s32.totalorder %s3112_s27, 9 }
  0x2a   : > { %4129 = sst [smem:[#allocation25_spill]] %s4128_s9 }
  0x2b   : > { %p428_p4 = pnand %p2378_p0, %p427_p1 }
  0x2c   : > { %s4094_s20 = sand.u32 (!%p428_p4), 1, %s3088_s21   ;;  %s4096_s11 = sand.u32 (!%p428_p4), 1, %s3076_s18  }
  0x2d   : > { %431 = sbr.rel (%p428_p4) target bundleno = 1729 (0x6c1), region = 60  ;;  %s2379_s13 = sshll.u32 (!%p428_p4), %s4094_s20, 7 }
  0x2e   : > { %s2380_s14 = sshll.u32 (!%p428_p4), %s4096_s11, 8  ;;  %p504_p2 = scmp.lt.s32.totalorder (!%p428_p4), %s3100_s24, 1 }
  0x2f   : > { %p525_p5 = scmp.lt.s32.totalorder (!%p428_p4), %s3096_s23, 3  ;;  %s4130_s0 = sld [smem:[#allocation26_spill]] (!%p428_p4) }
  0x30   : > { %s3329_s26 = scalar_lea.vmem (!%p428_p4), [#allocation3], %s2379_s13  ;;  %s3331_s30 = scalar_lea.vmem (!%p428_p4), [#allocation5], %s2380_s14 }
  0x31   : > { %p2391_p6 = scmp.ne.s32.totalorder (!%p428_p4), %s3096_s23, 0 }
  0x34   : > { %s505_s16 = scalar_select %p504_p2, %s3100_s24, 1 }
  0x35   : > { %s526_s28 = scalar_select %p525_p5, %s3096_s23, 3 }
  0x36   : > { %s2476_s29 = sshll.u32 %s505_s16, 6  ;;  %s2477_s12 = sshll.u32 %s505_s16, 7  ;;  %v3114_v0 = vmov (!%p2391_p6), 0.0  }
  0x37   : > { %s3312_s22 = scalar_lea.vmem %s4130_s0, %s2476_s29  ;;  %s3317_s9 = scalar_lea.vmem %s4070_s1, %s2477_s12  ;;  %548 = vst [vmem:[#allocation2] sm:$0xff] (!%p2391_p6), %v3114_v0  ;;  %549 = vst [vmem:[#allocation2 + $0x8] sm:$0xff] (!%p2391_p6), %v3114_v0 }
  0x38   : > { %s2385_s17 = sshll.u32 %s526_s28, 5  ;;  %547 = sbr.rel (%p2391_p6) target bundleno = 63 (0x3f), region = 64  ;;  %550 = vst [vmem:[#allocation2 + $0x10] sm:$0xff] (!%p2391_p6), %v3114_v0  ;;  %551 = vst [vmem:[#allocation2 + $0x18] sm:$0xff] (!%p2391_p6), %v3114_v0 }
  0x39   : > { %s529_s20 = sadd.s32 %s2477_s12, %s2385_s17  ;;  %552 = vst [vmem:[#allocation2 + $0x20] sm:$0xff] (!%p2391_p6), %v3114_v0  ;;  %553 = vst [vmem:[#allocation2 + $0x28] sm:$0xff] (!%p2391_p6), %v3114_v0 }
  0x3a   : > { %s2387_s10 = sshll.u32 %s529_s20, 2  ;;  %554 = vst [vmem:[#allocation2 + $0x30] sm:$0xff] (!%p2391_p6), %v3114_v0  ;;  %555 = vst [vmem:[#allocation2 + $0x38] sm:$0xff] (!%p2391_p6), %v3114_v0 }
  0x3b   : > { %s3322_s15 = scalar_lea.vmem %s4071_s2, %s2387_s10  ;;  %s3327_s21 = scalar_lea.vmem %s4072_s3, %s2387_s10  ;;  %556 = vst [vmem:[#allocation2 + $0x40] sm:$0xff] (!%p2391_p6), %v3114_v0  ;;  %557 = vst [vmem:[#allocation2 + $0x48] sm:$0xff] (!%p2391_p6), %v3114_v0 }
  0x3c   : > { %558 = vst [vmem:[#allocation2 + $0x50] sm:$0xff] (!%p2391_p6), %v3114_v0  ;;  %559 = vst [vmem:[#allocation2 + $0x58] sm:$0xff] (!%p2391_p6), %v3114_v0 }
  0x3d   : > { %560 = vst [vmem:[#allocation2 + $0x60] sm:$0xff] (!%p2391_p6), %v3114_v0  ;;  %561 = vst [vmem:[#allocation2 + $0x68] sm:$0xff] (!%p2391_p6), %v3114_v0 }
  0x3e   : > { %562 = vst [vmem:[#allocation2 + $0x70] sm:$0xff] (!%p2391_p6), %v3114_v0  ;;  %563 = vst [vmem:[#allocation2 + $0x78] sm:$0xff] (!%p2391_p6), %v3114_v0 }
  0x3f PF: > { %s2478_s10 = sshll.u32 %s3096_s23, 6  ;;  %v2792_v1 = vld [vmem:[%s3312_s22] sm:$0xff]   ;;  %vm952_vm0 = vcmask 261120   ;;  %v2802_v10 = vld [vmem:[%s3322_s15 + $0x48] sm:$0xff]   ;;  %v2804_v16 = vld [vmem:[%s3322_s15 + $0x50] sm:$0xff]   ;;  %s599_s27 = scalar_lea.vmem %s4074_s5, %s3096_s23 }
  0x40   : > { %s582_s19 = scalar_lea.vmem %s4073_s4, %s2478_s10  ;;  %2619 = vmatprep.mubr.bf16.mxu0 %v2792_v1  ;;  %v2800_v8 = vld [vmem:[%s3322_s15 + $0x40] sm:$0xff]   ;;  %v2803_v12 = vld [vmem:[%s3322_s15 + $0x8] sm:$0xff]   ;;  %v2805_v17 = vld [vmem:[%s3322_s15 + $0x10] sm:$0xff]   ;;  %p2463_p8 = scmp.ne.s32.totalorder %s3096_s23, 3 }
  0x41   : > { %v2784_v2 = vld [vmem:[%s582_s19] sm:$0xff]   ;;  %v2785_v3 = vld [vmem:[%s582_s19 + $0x8] sm:$0xff]   ;;  %v2786_v4 = vld [vmem:[%s582_s19 + $0x10] sm:$0xff]   ;;  %2671 = vmatprep.subr.msk.bf16.mxu1 %vm952_vm0, %v2800_v8  ;;  %v981_v15 = vsel %vm952_vm0, %v2803_v12, 0  ;;  %v984_v21 = vsel %vm952_vm0, %v2805_v17, 0  ;;  %s4131_s16 = sld [smem:[#allocation27_spill]] (!%p2463_p8) }
  0x42   : > { %2603 = vmatprep.subr.bf16.mxu0 %v2784_v2  ;;  %v2787_v5 = vld [vmem:[%s582_s19 + $0x18] sm:$0xff]   ;;  %v2788_v6 = vld [vmem:[%s582_s19 + $0x20] sm:$0xff]   ;;  %v2789_v7 = vld [vmem:[%s582_s19 + $0x28] sm:$0xff]  }
  0x43   : > { %2604 = vmatpush3.bf16.msra.mxu0 %v2784_v2  ;;  %v2801_v9 = vld [vmem:[%s3322_s15] sm:$0xff]   ;;  %v2790_v13 = vld [vmem:[%s582_s19 + $0x30] sm:$0xff]   ;;  %v2791_v14 = vld [vmem:[%s582_s19 + $0x38] sm:$0xff]  }
  0x44   : > { %2605 = vmatprep.subr.bf16.mxu0 %v2785_v3  ;;  %v978_v11 = vsel %vm952_vm0, %v2801_v9, 0  ;;  %v2807_v18 = vld [vmem:[%s3322_s15 + $0x18] sm:$0xff]   ;;  %v2793_v19 = vld [vmem:[%s3312_s22 + $0x8] sm:$0xff]   ;;  %v2794_v20 = vld [vmem:[%s3312_s22 + $0x10] sm:$0xff]  }
  0x45   : > { %2498 = vmatpush3.bf16.xpose.msra.mxu1 %v978_v11  ;;  %v2806_v22 = vld [vmem:[%s3322_s15 + $0x58] sm:$0xff]   ;;  %v987_v23 = vsel %vm952_vm0, %v2807_v18, 0  ;;  %v2796_v25 = vld [vmem:[%s3312_s22 + $0x20] sm:$0xff]   ;;  %v2797_v28 = vld [vmem:[%s3312_s22 + $0x28] sm:$0xff]  }
  0x46   : > { %2672 = vmatprep.subr.msk.bf16.mxu1 %vm952_vm0, %v2802_v10  ;;  %v2795_v24 = vld [vmem:[%s3312_s22 + $0x18] sm:$0xff]   ;;  %v2808_v26 = vld [vmem:[%s3322_s15 + $0x60] sm:$0xff]   ;;  %v2798_v29 = vld [vmem:[%s3312_s22 + $0x30] sm:$0xff]  }
  0x47   : > { %2606 = vmatpush3.bf16.msra.mxu0 %v2785_v3  ;;  %v2809_v27 = vld [vmem:[%s3322_s15 + $0x20] sm:$0xff]   ;;  %v2810_v31 = vld [vmem:[%s3322_s15 + $0x68] sm:$0xff]   ;;  %v2799_v33 = vld [vmem:[%s3312_s22 + $0x38] sm:$0xff]  }
  0x48   : > { %2607 = vmatprep.subr.bf16.mxu0 %v2786_v4  ;;  %v990_v30 = vsel %vm952_vm0, %v2809_v27, 0  ;;  %v2811_v32 = vld [vmem:[%s3322_s15 + $0x28] sm:$0xff]   ;;  %v2812_v35 = vld [vmem:[%s3322_s15 + $0x70] sm:$0xff]   ;;  %v2814_v38 = vld [vmem:[%s3322_s15 + $0x78] sm:$0xff]  }
  0x49   : > { %v993_v34 = vsel %vm952_vm0, %v2811_v32, 0  ;;  %v2813_v36 = vld [vmem:[%s3322_s15 + $0x30] sm:$0xff]   ;;  %v2815_v39 = vld [vmem:[%s3322_s15 + $0x38] sm:$0xff]   ;;  %v2394_v42 = vld [vmem:[%s599_s27] ss:$0 sm:$0xff] }
  0x4a   : > { %v996_v37 = vsel %vm952_vm0, %v2813_v36, 0  ;;  %v999_v40 = vsel %vm952_vm0, %v2815_v39, 0 }
  0x4b   : > { %2608 = vmatpush3.bf16.msra.mxu0 %v2786_v4 }
  0x4c   : > { %2609 = vmatprep.subr.bf16.mxu0 %v2787_v5 }
  0x4d   : > { %2500 = vmatpush3.bf16.xpose.msra.mxu1 %v981_v15 }
  0x4e   : > { %2673 = vmatprep.subr.msk.bf16.mxu1 %vm952_vm0, %v2804_v16 }
  0x4f   : > { %2610 = vmatpush3.bf16.msra.mxu0 %v2787_v5 }
  0x50   : > { %2611 = vmatprep.subr.bf16.mxu0 %v2788_v6 }
  0x53   : > { %2612 = vmatpush3.bf16.msra.mxu0 %v2788_v6 }
  0x54   : > { %2613 = vmatprep.subr.bf16.mxu0 %v2789_v7 }
  0x55   : > { %2502 = vmatpush3.bf16.xpose.msra.mxu1 %v984_v21 }
  0x56   : > { %2674 = vmatprep.subr.msk.bf16.mxu1 %vm952_vm0, %v2806_v22 }
  0x57   : > { %2614 = vmatpush3.bf16.msra.mxu0 %v2789_v7 }
  0x58   : > { %2615 = vmatprep.subr.bf16.mxu0 %v2790_v13 }
  0x5b   : > { %2616 = vmatpush3.bf16.msra.mxu0 %v2790_v13 }
  0x5c   : > { %2617 = vmatprep.subr.bf16.mxu0 %v2791_v14 }
  0x5d   : > { %2504 = vmatpush3.bf16.xpose.msra.mxu1 %v987_v23 }
  0x5e   : > { %2675 = vmatprep.subr.msk.bf16.mxu1 %vm952_vm0, %v2808_v26 }
  0x5f   : > { %2618 = vmatpush3.bf16.msra.mxu0 %v2791_v14 }
  0x62   : > { %2620 = vmatmul.mubr.bf16.vlgmr.msra.gmra.mrb[0].mxu0 %v2793_v19 }
  0x63   : > { %2623 = vmatprep.mubr.bf16.mxu0 %v2794_v20 }
  0x65   : > { %2506 = vmatpush3.bf16.xpose.msra.mxu1 %v990_v30 }
  0x66   : > { %2676 = vmatprep.subr.msk.bf16.mxu1 %vm952_vm0, %v2810_v31 }
  0x6a   : > { %2624 = vmatmul.mubr.bf16.gmra.mrb[4].mxu0 %v2795_v24 }
  0x6b   : > { %2627 = vmatprep.mubr.bf16.mxu0 %v2796_v25 }
  0x6d   : > { %2508 = vmatpush3.bf16.xpose.msra.mxu1 %v993_v34 }
  0x6e   : > { %2677 = vmatprep.subr.msk.bf16.mxu1 %vm952_vm0, %v2812_v35 }
  0x72   : > { %2628 = vmatmul.mubr.bf16.gmra.mrb[8].mxu0 %v2797_v28 }
  0x73   : > { %2631 = vmatprep.mubr.bf16.mxu0 %v2798_v29 }
  0x75   : > { %2510 = vmatpush3.bf16.xpose.msra.mxu1 %v996_v37 }
  0x76   : > { %2678 = vmatprep.subr.msk.bf16.mxu1 %vm952_vm0, %v2814_v38 }
  0x7a   : > { %2632 = vmatmul.mubr.bf16.gmra.mrb[12].mxu0 %v2799_v33 }
  0x7d   : > { %2512 = vmatpush3.bf16.xpose.msra.mxu1 %v999_v40 }
 0x135   : > { %v2621_v41 = vpop.f32.mrb[0].mxu0 }
 0x136   : > { %v737_v43 = vpop.f32.mrb[1].mxu0  ;;  %v746_v45 = vadd.f32 %v2621_v41, %v2394_v42 }
 0x137   : > { %v2622_v44 = vpop.f32.mrb[2].mxu0  ;;  %v738_v48 = vadd.f32 %v2394_v42, %v737_v43 }
 0x138   : > { %v749_v46 = vadd.f32 %v2622_v44, %v2394_v42  ;;  %v740_v47 = vpop.f32.mrb[3].mxu0 }
 0x139   : > { %v741_v49 = vadd.f32 %v2394_v42, %v740_v47 }
 0x13a   : > { %v865_v50 = vpack.c.bf16 %v749_v46, %v746_v45 }
 0x13b   : > { %v864_v51 = vpack.c.bf16 %v741_v49, %v738_v48 }
 0x13d   : > { %2513 = vmatprep.mubr.msk.bf16.mxu1 %vm952_vm0, %v864_v51  ;;  %v2625_v52 = vpop.f32.mrb[4].mxu0 }
 0x13e   : > { %2514 = vmatmul.mubr.msk.bf16.vlgmr.msra.gmra.mrb[0].mxu1 %vm952_vm0, %v864_v51  ;;  %v762_v53 = vadd.f32 %v2625_v52, %v2394_v42  ;;  %v753_v54 = vpop.f32.mrb[5].mxu0 }
 0x13f   : > { %2515 = vmatprep.mubr.msk.bf16.mxu1 %vm952_vm0, %v865_v50  ;;  %v754_v55 = vadd.f32 %v2394_v42, %v753_v54  ;;  %v2626_v56 = vpop.f32.mrb[6].mxu0 }
 0x140   : > { %v765_v57 = vadd.f32 %v2626_v56, %v2394_v42  ;;  %v756_v58 = vpop.f32.mrb[7].mxu0 }
 0x141   : > { %v757_v59 = vadd.f32 %v2394_v42, %v756_v58 }
 0x142   : > { %v867_v60 = vpack.c.bf16 %v765_v57, %v762_v53 }
 0x143   : > { %v866_v61 = vpack.c.bf16 %v757_v59, %v754_v55 }
 0x145   : > { %v2629_v62 = vpop.f32.mrb[8].mxu0 }
 0x146   : > { %2516 = vmatmul.mubr.msk.bf16.gmra.mrb[4].mxu1 %vm952_vm0, %v865_v50  ;;  %v778_v63 = vadd.f32 %v2629_v62, %v2394_v42  ;;  %v769_v0 = vpop.f32.mrb[9].mxu0 }
 0x147   : > { %2517 = vmatprep.mubr.msk.bf16.mxu1 %vm952_vm0, %v866_v61  ;;  %v770_v1 = vadd.f32 %v2394_v42, %v769_v0  ;;  %v2630_v2 = vpop.f32.mrb[10].mxu0 }
 0x148   : > { %v781_v3 = vadd.f32 %v2630_v2, %v2394_v42  ;;  %v772_v4 = vpop.f32.mrb[11].mxu0  ;;  %v2816_v2 = vld [vmem:[%s3327_s21 + $0x40] sm:$0xff]  }
 0x149   : > { %v773_v5 = vadd.f32 %v2394_v42, %v772_v4  ;;  %v2818_v4 = vld [vmem:[%s3327_s21 + $0x48] sm:$0xff]   ;;  %2529 = vmatprep.subr.bf16.mxu0 %v2816_v2  ;;  %2655 = vmatprep.subr.bf16.mxu1 %v2816_v2 }
 0x14a   : > { %v869_v6 = vpack.c.bf16 %v781_v3, %v778_v63  ;;  %v2817_v3 = vld [vmem:[%s3327_s21] sm:$0xff]  }
 0x14b   : > { %v868_v7 = vpack.c.bf16 %v773_v5, %v770_v1  ;;  %2530 = vmatpush3.bf16.msra.mxu0 %v2817_v3  ;;  %v2819_v5 = vld [vmem:[%s3327_s21 + $0x8] sm:$0xff]   ;;  %2663 = vmatpush3.bf16.msra.mxu1 %v2817_v3 }
 0x14c   : > { %2531 = vmatprep.subr.bf16.mxu0 %v2818_v4  ;;  %2656 = vmatprep.subr.bf16.mxu1 %v2818_v4 }
 0x14d   : > { %v2633_v8 = vpop.f32.mrb[12].mxu0 }
 0x14e   : > { %2518 = vmatmul.mubr.msk.bf16.gmra.mrb[8].mxu1 %vm952_vm0, %v866_v61  ;;  %v794_v9 = vadd.f32 %v2633_v8, %v2394_v42  ;;  %v785_v10 = vpop.f32.mrb[13].mxu0 }
 0x14f   : > { %2519 = vmatprep.mubr.msk.bf16.mxu1 %vm952_vm0, %v867_v60  ;;  %v786_v11 = vadd.f32 %v2394_v42, %v785_v10  ;;  %v2634_v12 = vpop.f32.mrb[14].mxu0  ;;  %2532 = vmatpush3.bf16.msra.mxu0 %v2819_v5 }
 0x150   : > { %v797_v13 = vadd.f32 %v2634_v12, %v2394_v42  ;;  %v788_v14 = vpop.f32.mrb[15].mxu0  ;;  %2664 = vmatpush3.bf16.msra.mxu1 %v2819_v5 }
 0x151   : > { %v789_v15 = vadd.f32 %v2394_v42, %v788_v14 }
 0x152   : > { %v871_v16 = vpack.c.bf16 %v797_v13, %v794_v9 }
 0x153   : > { %v870_v17 = vpack.c.bf16 %v789_v15, %v786_v11 }
 0x156   : > { %2520 = vmatmul.mubr.msk.bf16.gmra.mrb[12].mxu1 %vm952_vm0, %v867_v60 }
 0x157   : > { %2521 = vmatprep.mubr.msk.bf16.mxu1 %vm952_vm0, %v868_v7 }
 0x15e   : > { %2522 = vmatmul.mubr.msk.bf16.gmra.mrb[16].mxu1 %vm952_vm0, %v868_v7  ;;  %v2821_v7 = vld [vmem:[%s3327_s21 + $0x10] sm:$0xff]  }
 0x15f   : > { %2523 = vmatprep.mubr.msk.bf16.mxu1 %vm952_vm0, %v869_v6 }
 0x166   : > { %2524 = vmatmul.mubr.msk.bf16.gmra.mrb[20].mxu1 %vm952_vm0, %v869_v6  ;;  %v2820_v6 = vld [vmem:[%s3327_s21 + $0x50] sm:$0xff]  }
 0x167   : > { %2525 = vmatprep.mubr.msk.bf16.mxu1 %vm952_vm0, %v870_v17  ;;  %2533 = vmatprep.subr.bf16.mxu0 %v2820_v6 }
 0x168   : > { %2657 = vmatprep.subr.bf16.mxu1 %v2820_v6  ;;  %2534 = vmatpush3.bf16.msra.mxu0 %v2821_v7 }
 0x169   : > { %2665 = vmatpush3.bf16.msra.mxu1 %v2821_v7 }
 0x16e   : > { %2526 = vmatmul.mubr.msk.bf16.gmra.mrb[24].mxu1 %vm952_vm0, %v870_v17 }
 0x16f   : > { %2527 = vmatprep.mubr.msk.bf16.mxu1 %vm952_vm0, %v871_v16 }
 0x176   : > { %2528 = vmatmul.mubr.msk.bf16.gmra.mrb[28].mxu1 %vm952_vm0, %v871_v16 }
 0x211   : > { %v3398_v18 = vpop.f32.mrb[0].mxu1 }
 0x212   : > { %v3400_v19 = vpop.f32.mrb[1].mxu1 }
 0x213   : > { %v3402_v20 = vpop.f32.mrb[2].mxu1  ;;  %v1138_v21 = vmax.f32 %v3398_v18, %v3400_v19 }
 0x214   : > { %v3406_v22 = vpop.f32.mrb[3].mxu1 }
 0x215   : > { %1139 = vmax.xlane.f32.xlu0 %v1138_v21  ;;  %v1141_v23 = vmax.f32 %v3402_v20, %v3406_v22 }
 0x219   : > { %1142 = vmax.xlane.f32.xlu0 %v1141_v23  ;;  %v3410_v24 = vpop.f32.mrb[4].mxu1 }
 0x21a   : > { %v3412_v25 = vpop.f32.mrb[5].mxu1 }
 0x21b   : > { %v3414_v26 = vpop.f32.mrb[6].mxu1  ;;  %v1144_v27 = vmax.f32 %v3410_v24, %v3412_v25 }
 0x21c   : > { %v3418_v28 = vpop.f32.mrb[7].mxu1 }
 0x21d   : > { %1145 = vmax.xlane.f32.xlu1 %v1144_v27  ;;  %v1147_v29 = vmax.f32 %v3414_v26, %v3418_v28 }
 0x221   : > { %1148 = vmax.xlane.f32.xlu1 %v1147_v29  ;;  %v3422_v30 = vpop.f32.mrb[8].mxu1 }
 0x222   : > { %v3424_v31 = vpop.f32.mrb[9].mxu1 }
 0x223   : > { %v3426_v32 = vpop.f32.mrb[10].mxu1  ;;  %v1150_v33 = vmax.f32 %v3422_v30, %v3424_v31 }
 0x224   : > { %v3430_v34 = vpop.f32.mrb[11].mxu1 }
 0x225   : > { %1151 = vmax.xlane.f32.xlu0 %v1150_v33  ;;  %v1153_v35 = vmax.f32 %v3426_v32, %v3430_v34 }
 0x227   : > { %1154 = vmax.xlane.f32.xlu1 %v1153_v35 }
 0x229   : > { %v3434_v36 = vpop.f32.mrb[12].mxu1 }
 0x22a   : > { %v3436_v37 = vpop.f32.mrb[13].mxu1 }
 0x22b   : > { %v3438_v38 = vpop.f32.mrb[14].mxu1  ;;  %v1156_v39 = vmax.f32 %v3434_v36, %v3436_v37 }
 0x22c   : > { %v3442_v40 = vpop.f32.mrb[15].mxu1 }
 0x22d   : > { %1157 = vmax.xlane.f32.xlu0 %v1156_v39  ;;  %v1159_v41 = vmax.f32 %v3438_v38, %v3442_v40 }
 0x22f   : > { %1160 = vmax.xlane.f32.xlu1 %v1159_v41 }
 0x231   : > { %v3446_v42 = vpop.f32.mrb[16].mxu1 }
 0x232   : > { %v3448_v43 = vpop.f32.mrb[17].mxu1 }
 0x233   : > { %v3450_v44 = vpop.f32.mrb[18].mxu1  ;;  %v1162_v45 = vmax.f32 %v3446_v42, %v3448_v43 }
 0x234   : > { %v3454_v46 = vpop.f32.mrb[19].mxu1 }
 0x235   : > { %1163 = vmax.xlane.f32.xlu0 %v1162_v45  ;;  %v1165_v47 = vmax.f32 %v3450_v44, %v3454_v46 }
 0x237   : > { %1166 = vmax.xlane.f32.xlu1 %v1165_v47 }
 0x239   : > { %v3458_v48 = vpop.f32.mrb[20].mxu1 }
 0x23a   : > { %v3460_v49 = vpop.f32.mrb[21].mxu1 }
 0x23b   : > { %v3462_v50 = vpop.f32.mrb[22].mxu1  ;;  %v1168_v51 = vmax.f32 %v3458_v48, %v3460_v49 }
 0x23c   : > { %v3466_v52 = vpop.f32.mrb[23].mxu1 }
 0x23d   : > { %1169 = vmax.xlane.f32.xlu0 %v1168_v51  ;;  %v1171_v53 = vmax.f32 %v3462_v50, %v3466_v52 }
 0x23f   : > { %1172 = vmax.xlane.f32.xlu1 %v1171_v53 }
 0x241   : > { %v3470_v54 = vpop.f32.mrb[24].mxu1 }
 0x242   : > { %v3472_v55 = vpop.f32.mrb[25].mxu1 }
 0x243   : > { %v3474_v56 = vpop.f32.mrb[26].mxu1  ;;  %v1174_v57 = vmax.f32 %v3470_v54, %v3472_v55 }
 0x244   : > { %v3478_v58 = vpop.f32.mrb[27].mxu1 }
 0x245   : > { %1175 = vmax.xlane.f32.xlu0 %v1174_v57  ;;  %v1177_v59 = vmax.f32 %v3474_v56, %v3478_v58 }
 0x247   : > { %1178 = vmax.xlane.f32.xlu1 %v1177_v59 }
 0x249   : > { %v3482_v60 = vpop.f32.mrb[28].mxu1 }
 0x24a   : > { %v3484_v61 = vpop.f32.mrb[29].mxu1 }
 0x24b   : > { %v3486_v62 = vpop.f32.mrb[30].mxu1  ;;  %v1180_v63 = vmax.f32 %v3482_v60, %v3484_v61 }
 0x24c   : > { %v3490_v0 = vpop.f32.mrb[31].mxu1 }
 0x24d   : > { %1181 = vmax.xlane.f32.xlu0 %v1180_v63  ;;  %v1183_v1 = vmax.f32 %v3486_v62, %v3490_v0 }
 0x24f   : > { %1184 = vmax.xlane.f32.xlu1 %v1183_v1 }
 0x2a2   : > { %v1140_v8 = vpop.xlane.xlu0 %1139 }
 0x2a3   : > { %v1186_v9 = vsub.f32 %v3398_v18, %v1140_v8  ;;  %v1187_v10 = vsub.f32 %v3400_v19, %v1140_v8 }
 0x2a5   : > { %v1218_v11 = vmul.f32 1.442695, %v1186_v9  ;;  %v1220_v12 = vmul.f32 1.442695, %v1187_v10 }
 0x2a6   : > { %v1143_v13 = vpop.xlane.xlu0 %1142 }
 0x2a7   : > { %2834 = vpow2.f32 %v1218_v11  ;;  %v1188_v14 = vsub.f32 %v3402_v20, %v1143_v13  ;;  %v1189_v15 = vsub.f32 %v3406_v22, %v1143_v13 }
 0x2a8   : > { %2836 = vpow2.f32 %v1220_v12 }
 0x2a9   : > { %v1222_v16 = vmul.f32 1.442695, %v1188_v14  ;;  %v1224_v17 = vmul.f32 1.442695, %v1189_v15 }
 0x2aa   : > { %v1146_v21 = vpop.xlane.xlu1 %1145 }
 0x2ab   : > { %2838 = vpow2.f32 %v1222_v16  ;;  %v1190_v23 = vsub.f32 %v3410_v24, %v1146_v21  ;;  %v1191_v27 = vsub.f32 %v3412_v25, %v1146_v21 }
 0x2ac   : > { %2840 = vpow2.f32 %v1224_v17 }
 0x2ad   : > { %v1226_v18 = vmul.f32 1.442695, %v1190_v23  ;;  %v1228_v19 = vmul.f32 1.442695, %v1191_v27  ;;  %v2823_v27 = vld [vmem:[%s3327_s21 + $0x18] sm:$0xff]  }
 0x2ae   : > { %v1149_v29 = vpop.xlane.xlu1 %1148 }
 0x2af   : > { %2842 = vpow2.f32 %v1226_v18  ;;  %v1192_v33 = vsub.f32 %v3414_v26, %v1149_v29  ;;  %v1193_v20 = vsub.f32 %v3418_v28, %v1149_v29 }
 0x2b0   : > { %2844 = vpow2.f32 %v1228_v19 }
 0x2b1   : > { %v3508_v22 = vpop.eup %2834  ;;  %v1230_v35 = vmul.f32 1.442695, %v1192_v33  ;;  %v1232_v39 = vmul.f32 1.442695, %v1193_v20 }
 0x2b2   : > { %v3510_v41 = vpop.eup %2836  ;;  %v1152_v45 = vpop.xlane.xlu0 %1151 }
 0x2b3   : > { %2846 = vpow2.f32 %v1230_v35  ;;  %v1194_v24 = vsub.f32 %v3422_v30, %v1152_v45  ;;  %v1195_v25 = vsub.f32 %v3424_v31, %v1152_v45  ;;  %v1282_v47 = vadd.f32 %v3510_v41, %v3508_v22 }
 0x2b4   : > { %2848 = vpow2.f32 %v1232_v39  ;;  %v1155_v26 = vpop.xlane.xlu1 %1154 }
 0x2b5   : > { %v3516_v51 = vpop.eup %2838  ;;  %v1234_v28 = vmul.f32 1.442695, %v1194_v24  ;;  %v1236_v53 = vmul.f32 1.442695, %v1195_v25  ;;  %v1196_v57 = vsub.f32 %v3426_v32, %v1155_v26  ;;  %v1197_v59 = vsub.f32 %v3430_v34, %v1155_v26  ;;  %1283 = vadd.xlane.f32.xlu0 %v1282_v47  ;;  %v2825_v24 = vld [vmem:[%s3327_s21 + $0x20] sm:$0xff]   ;;  %v2826_v47 = vld [vmem:[%s3327_s21 + $0x68] sm:$0xff]  }
 0x2b6   : > { %v3520_v63 = vpop.eup %2840 }
 0x2b7   : > { %2850 = vpow2.f32 %v1234_v28  ;;  %v1238_v30 = vmul.f32 1.442695, %v1196_v57  ;;  %v1240_v1 = vmul.f32 1.442695, %v1197_v59  ;;  %v1285_v31 = vadd.f32 %v3520_v63, %v3516_v51  ;;  %v2827_v59 = vld [vmem:[%s3327_s21 + $0x28] sm:$0xff]  }
 0x2b8   : > { %2852 = vpow2.f32 %v1236_v53 }
 0x2b9   : > { %v3524_v2 = vpop.eup %2842  ;;  %2854 = vpow2.f32 %v1238_v30  ;;  %1286 = vadd.xlane.f32.xlu1 %v1285_v31 }
 0x2ba   : > { %v3526_v3 = vpop.eup %2844  ;;  %2856 = vpow2.f32 %v1240_v1  ;;  %v1158_v32 = vpop.xlane.xlu0 %1157 }
 0x2bb   : > { %v1198_v34 = vsub.f32 %v3434_v36, %v1158_v32  ;;  %v1199_v4 = vsub.f32 %v3436_v37, %v1158_v32  ;;  %v1288_v5 = vadd.f32 %v3526_v3, %v3524_v2 }
 0x2bc   : > { %v1161_v6 = vpop.xlane.xlu1 %1160 }
 0x2bd   : > { %v3532_v7 = vpop.eup %2846  ;;  %v1242_v8 = vmul.f32 1.442695, %v1198_v34  ;;  %v1244_v9 = vmul.f32 1.442695, %v1199_v4  ;;  %v1200_v10 = vsub.f32 %v3438_v38, %v1161_v6  ;;  %v1201_v11 = vsub.f32 %v3442_v40, %v1161_v6  ;;  %1289 = vadd.xlane.f32.xlu0 %v1288_v5  ;;  %v2822_v40 = vld [vmem:[%s3327_s21 + $0x58] sm:$0xff]  }
 0x2be   : > { %v3536_v12 = vpop.eup %2848  ;;  %2535 = vmatprep.subr.bf16.mxu0 %v2822_v40  ;;  %2658 = vmatprep.subr.bf16.mxu1 %v2822_v40 }
 0x2bf   : > { %2858 = vpow2.f32 %v1242_v8  ;;  %v1246_v36 = vmul.f32 1.442695, %v1200_v10  ;;  %v1248_v37 = vmul.f32 1.442695, %v1201_v11  ;;  %v1291_v13 = vadd.f32 %v3536_v12, %v3532_v7  ;;  %2536 = vmatpush3.bf16.msra.mxu0 %v2823_v27  ;;  %2666 = vmatpush3.bf16.msra.mxu1 %v2823_v27  ;;  %v2829_v8 = vld [vmem:[%s3327_s21 + $0x30] sm:$0xff]   ;;  %v2830_v10 = vld [vmem:[%s3327_s21 + $0x78] sm:$0xff]  }
 0x2c0   : > { %2860 = vpow2.f32 %v1244_v9 }
 0x2c1   : > { %v3540_v14 = vpop.eup %2850  ;;  %2862 = vpow2.f32 %v1246_v36  ;;  %1292 = vadd.xlane.f32.xlu1 %v1291_v13 }
 0x2c2   : > { %v3542_v15 = vpop.eup %2852  ;;  %2864 = vpow2.f32 %v1248_v37  ;;  %v1164_v38 = vpop.xlane.xlu0 %1163 }
 0x2c3   : > { %v3545_v16 = vpop.eup %2854  ;;  %v1202_v17 = vsub.f32 %v3446_v42, %v1164_v38  ;;  %v1203_v21 = vsub.f32 %v3448_v43, %v1164_v38  ;;  %v1294_v23 = vadd.f32 %v3542_v15, %v3540_v14  ;;  %v2824_v43 = vld [vmem:[%s3327_s21 + $0x60] sm:$0xff]   ;;  %v2831_v38 = vld [vmem:[%s3327_s21 + $0x38] sm:$0xff]  }
 0x2c4   : > { %v3552_v18 = vpop.eup %2856  ;;  %v1167_v19 = vpop.xlane.xlu1 %1166  ;;  %2537 = vmatprep.subr.bf16.mxu0 %v2824_v43  ;;  %2659 = vmatprep.subr.bf16.mxu1 %v2824_v43 }
 0x2c5   : > { %v1250_v29 = vmul.f32 1.442695, %v1202_v17  ;;  %v1252_v33 = vmul.f32 1.442695, %v1203_v21  ;;  %v1204_v20 = vsub.f32 %v3450_v44, %v1167_v19  ;;  %v1205_v35 = vsub.f32 %v3454_v46, %v1167_v19  ;;  %1295 = vadd.xlane.f32.xlu0 %v1294_v23  ;;  %2538 = vmatpush3.bf16.msra.mxu0 %v2825_v24 }
 0x2c6   : > { %v1297_v42 = vadd.f32 %v3552_v18, %v3545_v16  ;;  %2667 = vmatpush3.bf16.msra.mxu1 %v2825_v24  ;;  %2539 = vmatprep.subr.bf16.mxu0 %v2826_v47 }
 0x2c7   : > { %2866 = vpow2.f32 %v1250_v29  ;;  %v1254_v39 = vmul.f32 1.442695, %v1204_v20  ;;  %v1256_v45 = vmul.f32 1.442695, %v1205_v35  ;;  %2660 = vmatprep.subr.bf16.mxu1 %v2826_v47 }
 0x2c8   : > { %2868 = vpow2.f32 %v1252_v33  ;;  %1298 = vadd.xlane.f32.xlu1 %v1297_v42 }
 0x2c9   : > { %v3560_v25 = vpop.eup %2858  ;;  %2870 = vpow2.f32 %v1254_v39  ;;  %2540 = vmatpush3.bf16.msra.mxu0 %v2827_v59 }
 0x2ca   : > { %v3562_v44 = vpop.eup %2860  ;;  %2872 = vpow2.f32 %v1256_v45  ;;  %v1170_v46 = vpop.xlane.xlu0 %1169  ;;  %2668 = vmatpush3.bf16.msra.mxu1 %v2827_v59 }
 0x2cb   : > { %v3565_v26 = vpop.eup %2862  ;;  %v1206_v28 = vsub.f32 %v3458_v48, %v1170_v46  ;;  %v1207_v53 = vsub.f32 %v3460_v49, %v1170_v46  ;;  %v1300_v57 = vadd.f32 %v3562_v44, %v3560_v25  ;;  %v2828_v49 = vld [vmem:[%s3327_s21 + $0x70] sm:$0xff]   ;;  %s2479_s21 = sshll.u32 %s3096_s23, 4 }
 0x2cc   : > { %v3572_v30 = vpop.eup %2864  ;;  %v1173_v1 = vpop.xlane.xlu1 %1172  ;;  %2541 = vmatprep.subr.bf16.mxu0 %v2828_v49  ;;  %2661 = vmatprep.subr.bf16.mxu1 %v2828_v49  ;;  %s3642_s20 = scalar_lea.vmem %s4075_s6, %s2479_s21 }
 0x2cd   : > { %v1258_v31 = vmul.f32 1.442695, %v1206_v28  ;;  %v1260_v32 = vmul.f32 1.442695, %v1207_v53  ;;  %v1208_v34 = vsub.f32 %v3462_v50, %v1173_v1  ;;  %v1209_v4 = vsub.f32 %v3466_v52, %v1173_v1  ;;  %1301 = vadd.xlane.f32.xlu0 %v1300_v57  ;;  %2542 = vmatpush3.bf16.msra.mxu0 %v2829_v8 }
 0x2ce   : > { %v1303_v48 = vadd.f32 %v3572_v30, %v3565_v26  ;;  %2669 = vmatpush3.bf16.msra.mxu1 %v2829_v8  ;;  %2543 = vmatprep.subr.bf16.mxu0 %v2830_v10 }
 0x2cf   : > { %2874 = vpow2.f32 %v1258_v31  ;;  %v1262_v5 = vmul.f32 1.442695, %v1208_v34  ;;  %v1264_v6 = vmul.f32 1.442695, %v1209_v4  ;;  %2662 = vmatprep.subr.bf16.mxu1 %v2830_v10 }
 0x2d0   : > { %2876 = vpow2.f32 %v1260_v32  ;;  %1304 = vadd.xlane.f32.xlu1 %v1303_v48 }
 0x2d1   : > { %v3580_v9 = vpop.eup %2866  ;;  %2878 = vpow2.f32 %v1262_v5  ;;  %2544 = vmatpush3.bf16.msra.mxu0 %v2831_v38 }
 0x2d2   : > { %v3582_v50 = vpop.eup %2868  ;;  %2880 = vpow2.f32 %v1264_v6  ;;  %v1176_v52 = vpop.xlane.xlu0 %1175  ;;  %2670 = vmatpush3.bf16.msra.mxu1 %v2831_v38  ;;  %v2832_v6 = vld [vmem:[%s3642_s20] sm:$0xff]  }
 0x2d3   : > { %v3585_v11 = vpop.eup %2870  ;;  %v1210_v36 = vsub.f32 %v3470_v54, %v1176_v52  ;;  %v1211_v37 = vsub.f32 %v3472_v55, %v1176_v52  ;;  %v1306_v13 = vadd.f32 %v3582_v50, %v3580_v9  ;;  %2635 = vmatprep.subr.bf16.mxu0 %v2832_v6 }
 0x2d4   : > { %v3592_v40 = vpop.eup %2872  ;;  %v1179_v17 = vpop.xlane.xlu1 %1178 }
 0x2d5   : > { %v1266_v21 = vmul.f32 1.442695, %v1210_v36  ;;  %v1268_v23 = vmul.f32 1.442695, %v1211_v37  ;;  %v1212_v27 = vsub.f32 %v3474_v56, %v1179_v17  ;;  %v1213_v19 = vsub.f32 %v3478_v58, %v1179_v17  ;;  %1307 = vadd.xlane.f32.xlu0 %v1306_v13 }
 0x2d6   : > { %v1309_v54 = vadd.f32 %v3592_v40, %v3585_v11 }
 0x2d7   : > { %2882 = vpow2.f32 %v1266_v21  ;;  %v1270_v55 = vmul.f32 1.442695, %v1212_v27  ;;  %v1272_v29 = vmul.f32 1.442695, %v1213_v19 }
 0x2d8   : > { %2884 = vpow2.f32 %v1268_v23  ;;  %1310 = vadd.xlane.f32.xlu1 %v1309_v54 }
 0x2d9   : > { %v3598_v33 = vpop.eup %2874  ;;  %2886 = vpow2.f32 %v1270_v55 }
 0x2da   : > { %v3600_v20 = vpop.eup %2876  ;;  %2888 = vpow2.f32 %v1272_v29  ;;  %v1182_v56 = vpop.xlane.xlu0 %1181 }
 0x2db   : > { %v3602_v35 = vpop.eup %2878  ;;  %v1214_v58 = vsub.f32 %v3482_v60, %v1182_v56  ;;  %v1215_v42 = vsub.f32 %v3484_v61, %v1182_v56  ;;  %v1312_v43 = vadd.f32 %v3600_v20, %v3598_v33 }
 0x2dc   : > { %v3608_v39 = vpop.eup %2880  ;;  %v1185_v45 = vpop.xlane.xlu1 %1184 }
 0x2dd   : > { %v1274_v24 = vmul.f32 1.442695, %v1214_v58  ;;  %v1276_v46 = vmul.f32 1.442695, %v1215_v42  ;;  %1313 = vadd.xlane.f32.xlu0 %v1312_v43  ;;  %v1216_v47 = vsub.f32 %v3486_v62, %v1185_v45  ;;  %v1217_v28 = vsub.f32 %v3490_v0, %v1185_v45 }
 0x2de   : > { %v1315_v53 = vadd.f32 %v3608_v39, %v3602_v35 }
 0x2df   : > { %2890 = vpow2.f32 %v1274_v24  ;;  %v1278_v60 = vmul.f32 1.442695, %v1216_v47  ;;  %v1280_v57 = vmul.f32 1.442695, %v1217_v28 }
 0x2e0   : > { %2892 = vpow2.f32 %v1276_v46  ;;  %1316 = vadd.xlane.f32.xlu1 %v1315_v53 }
 0x2e1   : > { %v3614_v61 = vpop.eup %2882  ;;  %2894 = vpow2.f32 %v1278_v60 }
 0x2e2   : > { %v3616_v59 = vpop.eup %2884  ;;  %2896 = vpow2.f32 %v1280_v57 }
 0x2e3   : > { %v3618_v1 = vpop.eup %2886  ;;  %v1318_v62 = vadd.f32 %v3616_v59, %v3614_v61 }
 0x2e4   : > { %v3622_v0 = vpop.eup %2888 }
 0x2e5   : > { %1319 = vadd.xlane.f32.xlu0 %v1318_v62  ;;  %v1321_v31 = vadd.f32 %v3622_v0, %v3618_v1 }
 0x2e7   : > { %1322 = vadd.xlane.f32.xlu1 %v1321_v31 }
 0x2e9   : > { %v3626_v32 = vpop.eup %2890 }
 0x2ea   : > { %v3628_v34 = vpop.eup %2892 }
 0x2eb   : > { %v3630_v4 = vpop.eup %2894  ;;  %v1324_v48 = vadd.f32 %v3628_v34, %v3626_v32 }
 0x2ec   : > { %v3634_v49 = vpop.eup %2896 }
 0x2ed   : > { %1325 = vadd.xlane.f32.xlu0 %v1324_v48  ;;  %v1327_v5 = vadd.f32 %v3634_v49, %v3630_v4 }
 0x2ef   : > { %1328 = vadd.xlane.f32.xlu1 %v1327_v5 }
 0x342   : > { %v1284_v8 = vpop.xlane.xlu0 %1283 }
 0x343   : > { %2898 = vrcp.f32 %v1284_v8 }
 0x346   : > { %v1287_v52 = vpop.xlane.xlu1 %1286 }
 0x347   : > { %2900 = vrcp.f32 %v1287_v52 }
 0x34a   : > { %v1290_v10 = vpop.xlane.xlu0 %1289 }
 0x34b   : > { %2902 = vrcp.f32 %v1290_v10 }
 0x34d   : > { %v2899_v36 = vpop.eup %2898 }
 0x34e   : > { %v1362_v37 = vmul.f32 %v2899_v36, %v3508_v22  ;;  %v1293_v13 = vpop.xlane.xlu1 %1292  ;;  %v1363_v38 = vmul.f32 %v2899_v36, %v3510_v41 }
 0x34f   : > { %2904 = vrcp.f32 %v1293_v13 }
 0x350   : > { %1394 = vst [vmem:[%s3331_s30] sm:$0xff] %v1362_v37  ;;  %1395 = vst [vmem:[%s3331_s30 + $0x8] sm:$0xff] %v1363_v38 }
 0x351   : > { %v2901_v17 = vpop.eup %2900 }
 0x352   : > { %v1364_v21 = vmul.f32 %v2901_v17, %v3516_v51  ;;  %v1296_v23 = vpop.xlane.xlu0 %1295  ;;  %v1365_v27 = vmul.f32 %v2901_v17, %v3520_v63 }
 0x353   : > { %2906 = vrcp.f32 %v1296_v23 }
 0x354   : > { %1396 = vst [vmem:[%s3331_s30 + $0x10] sm:$0xff] %v1364_v21  ;;  %1397 = vst [vmem:[%s3331_s30 + $0x18] sm:$0xff] %v1365_v27  ;;  %v1427_v19 = vpack.c.bf16 %v1365_v27, %v1363_v38  ;;  %v1426_v54 = vpack.c.bf16 %v1364_v21, %v1362_v37 }
 0x355   : > { %v2903_v22 = vpop.eup %2902  ;;  %v1299_v55 = vpop.xlane.xlu1 %1298 }
 0x356   : > { %2908 = vrcp.f32 %v1299_v55  ;;  %1570 = vmatprep.mubr.bf16.mxu0 %v1427_v19  ;;  %v1367_v41 = vmul.f32 %v2903_v22, %v3526_v3  ;;  %v1366_v29 = vmul.f32 %v2903_v22, %v3524_v2 }
 0x357   : > { %1571 = vmatmul.mubr.bf16.vlgmr.msra.gmra.mrb[16].mxu0 %v1426_v54 }
 0x358   : > { %1399 = vst [vmem:[%s3331_s30 + $0x28] sm:$0xff] %v1367_v41  ;;  %1398 = vst [vmem:[%s3331_s30 + $0x20] sm:$0xff] %v1366_v29  ;;  %2636 = vmatpush3.bf16.msra.mxu0 %v2832_v6 }
 0x359   : > { %v2905_v51 = vpop.eup %2904 }
 0x35a   : > { %v1302_v63 = vpop.xlane.xlu0 %1301  ;;  %v1369_v56 = vmul.f32 %v2905_v51, %v3536_v12  ;;  %v1368_v58 = vmul.f32 %v2905_v51, %v3532_v7 }
 0x35b   : > { %2910 = vrcp.f32 %v1302_v63 }
 0x35c   : > { %1401 = vst [vmem:[%s3331_s30 + $0x38] sm:$0xff] %v1369_v56  ;;  %v1429_v42 = vpack.c.bf16 %v1369_v56, %v1367_v41  ;;  %1400 = vst [vmem:[%s3331_s30 + $0x30] sm:$0xff] %v1368_v58  ;;  %v1428_v3 = vpack.c.bf16 %v1368_v58, %v1366_v29  ;;  %v2833_v58 = vld [vmem:[%s3642_s20 + $0x8] sm:$0xff]  }
 0x35d   : > { %v2907_v43 = vpop.eup %2906  ;;  %v1305_v2 = vpop.xlane.xlu1 %1304  ;;  %2637 = vmatprep.subr.bf16.mxu0 %v2833_v58 }
 0x35e   : > { %2912 = vrcp.f32 %v1305_v2  ;;  %1578 = vmatprep.mubr.bf16.mxu0 %v1429_v42  ;;  %v1371_v45 = vmul.f32 %v2907_v43, %v3542_v15  ;;  %v1370_v24 = vmul.f32 %v2907_v43, %v3540_v14  ;;  %2638 = vmatpush3.bf16.msra.mxu0 %v2833_v58 }
 0x35f   : > { %1579 = vmatmul.mubr.bf16.gmra.mrb[20].mxu0 %v1428_v3 }
 0x360   : > { %v2909_v12 = vpop.eup %2908  ;;  %1403 = vst [vmem:[%s3331_s30 + $0x48] sm:$0xff] %v1371_v45  ;;  %1402 = vst [vmem:[%s3331_s30 + $0x40] sm:$0xff] %v1370_v24 }
 0x361   : > { %v1373_v7 = vmul.f32 %v2909_v12, %v3552_v18  ;;  %v1372_v46 = vmul.f32 %v2909_v12, %v3545_v16 }
 0x362   : > { %v1308_v47 = vpop.xlane.xlu0 %1307 }
 0x363   : > { %2914 = vrcp.f32 %v1308_v47  ;;  %1405 = vst [vmem:[%s3331_s30 + $0x58] sm:$0xff] %v1373_v7  ;;  %v1431_v28 = vpack.c.bf16 %v1373_v7, %v1371_v45  ;;  %1404 = vst [vmem:[%s3331_s30 + $0x50] sm:$0xff] %v1372_v46  ;;  %v1430_v15 = vpack.c.bf16 %v1372_v46, %v1370_v24 }
 0x365   : > { %v2911_v53 = vpop.eup %2910  ;;  %1586 = vmatprep.mubr.bf16.mxu0 %v1431_v28  ;;  %v1311_v14 = vpop.xlane.xlu1 %1310 }
 0x366   : > { %2916 = vrcp.f32 %v1311_v14  ;;  %v1375_v60 = vmul.f32 %v2911_v53, %v3562_v44  ;;  %v1374_v18 = vmul.f32 %v2911_v53, %v3560_v25 }
 0x367   : > { %1587 = vmatmul.mubr.bf16.gmra.mrb[24].mxu0 %v1430_v15 }
 0x368   : > { %v2913_v57 = vpop.eup %2912  ;;  %1407 = vst [vmem:[%s3331_s30 + $0x68] sm:$0xff] %v1375_v60  ;;  %1406 = vst [vmem:[%s3331_s30 + $0x60] sm:$0xff] %v1374_v18 }
 0x369   : > { %v1377_v16 = vmul.f32 %v2913_v57, %v3572_v30  ;;  %v1376_v62 = vmul.f32 %v2913_v57, %v3565_v26 }
 0x36a   : > { %v1314_v31 = vpop.xlane.xlu0 %1313 }
 0x36b   : > { %2918 = vrcp.f32 %v1314_v31  ;;  %1409 = vst [vmem:[%s3331_s30 + $0x78] sm:$0xff] %v1377_v16  ;;  %v1433_v48 = vpack.c.bf16 %v1377_v16, %v1375_v60  ;;  %1408 = vst [vmem:[%s3331_s30 + $0x70] sm:$0xff] %v1376_v62  ;;  %v1432_v44 = vpack.c.bf16 %v1376_v62, %v1374_v18 }
 0x36d   : > { %v2915_v5 = vpop.eup %2914  ;;  %1594 = vmatprep.mubr.bf16.mxu0 %v1433_v48  ;;  %v1317_v25 = vpop.xlane.xlu1 %1316 }
 0x36e   : > { %2920 = vrcp.f32 %v1317_v25  ;;  %v1379_v6 = vmul.f32 %v2915_v5, %v3582_v50  ;;  %v1378_v30 = vmul.f32 %v2915_v5, %v3580_v9 }
 0x36f   : > { %1595 = vmatmul.mubr.bf16.gmra.mrb[28].mxu0 %v1432_v44 }
 0x370   : > { %v2917_v8 = vpop.eup %2916  ;;  %1411 = vst [vmem:[%s3331_s30 + $0x88] sm:$0xff] %v1379_v6  ;;  %1410 = vst [vmem:[%s3331_s30 + $0x80] sm:$0xff] %v1378_v30 }
 0x371   : > { %v1381_v26 = vmul.f32 %v2917_v8, %v3592_v40  ;;  %v1380_v52 = vmul.f32 %v2917_v8, %v3585_v11 }
 0x372   : > { %v1320_v10 = vpop.xlane.xlu0 %1319 }
 0x373   : > { %2922 = vrcp.f32 %v1320_v10  ;;  %1413 = vst [vmem:[%s3331_s30 + $0x98] sm:$0xff] %v1381_v26  ;;  %v1435_v36 = vpack.c.bf16 %v1381_v26, %v1379_v6  ;;  %1412 = vst [vmem:[%s3331_s30 + $0x90] sm:$0xff] %v1380_v52  ;;  %v1434_v9 = vpack.c.bf16 %v1380_v52, %v1378_v30 }
 0x374   : > { %v1323_v37 = vpop.xlane.xlu1 %1322 }
 0x375   : > { %v2919_v50 = vpop.eup %2918  ;;  %1602 = vmatprep.mubr.bf16.mxu0 %v1435_v36  ;;  %2924 = vrcp.f32 %v1323_v37 }
 0x376   : > { %v1383_v13 = vmul.f32 %v2919_v50, %v3600_v20  ;;  %v1382_v40 = vmul.f32 %v2919_v50, %v3598_v33 }
 0x377   : > { %1603 = vmatmul.mubr.bf16.gmra.mrb[32].mxu0 %v1434_v9 }
 0x378   : > { %v2921_v38 = vpop.eup %2920  ;;  %1415 = vst [vmem:[%s3331_s30 + $0xa8] sm:$0xff] %v1383_v13  ;;  %1414 = vst [vmem:[%s3331_s30 + $0xa0] sm:$0xff] %v1382_v40 }
 0x379   : > { %v1385_v11 = vmul.f32 %v2921_v38, %v3608_v39  ;;  %v1384_v17 = vmul.f32 %v2921_v38, %v3602_v35 }
 0x37a   : > { %v1326_v21 = vpop.xlane.xlu0 %1325 }
 0x37b   : > { %2926 = vrcp.f32 %v1326_v21  ;;  %1417 = vst [vmem:[%s3331_s30 + $0xb8] sm:$0xff] %v1385_v11  ;;  %v1437_v23 = vpack.c.bf16 %v1385_v11, %v1383_v13  ;;  %1416 = vst [vmem:[%s3331_s30 + $0xb0] sm:$0xff] %v1384_v17  ;;  %v1436_v33 = vpack.c.bf16 %v1384_v17, %v1382_v40 }
 0x37c   : > { %v1329_v20 = vpop.xlane.xlu1 %1328 }
 0x37d   : > { %v2923_v27 = vpop.eup %2922  ;;  %1610 = vmatprep.mubr.bf16.mxu0 %v1437_v23  ;;  %2928 = vrcp.f32 %v1329_v20 }
 0x37e   : > { %v1386_v19 = vmul.f32 %v2923_v27, %v3614_v61  ;;  %v1387_v39 = vmul.f32 %v2923_v27, %v3616_v59 }
 0x37f   : > { %v2925_v54 = vpop.eup %2924  ;;  %1611 = vmatmul.mubr.bf16.gmra.mrb[36].mxu0 %v1436_v33 }
 0x380   : > { %1418 = vst [vmem:[%s3331_s30 + $0xc0] sm:$0xff] %v1386_v19  ;;  %v1388_v35 = vmul.f32 %v2925_v54, %v3618_v1  ;;  %v1389_v22 = vmul.f32 %v2925_v54, %v3622_v0  ;;  %1419 = vst [vmem:[%s3331_s30 + $0xc8] sm:$0xff] %v1387_v39 }
 0x382   : > { %1420 = vst [vmem:[%s3331_s30 + $0xd0] sm:$0xff] %v1388_v35  ;;  %1421 = vst [vmem:[%s3331_s30 + $0xd8] sm:$0xff] %v1389_v22  ;;  %v1439_v55 = vpack.c.bf16 %v1389_v22, %v1387_v39  ;;  %v1438_v41 = vpack.c.bf16 %v1388_v35, %v1386_v19 }
 0x384   : > { %1618 = vmatprep.mubr.bf16.mxu1 %v1439_v55 }
 0x385   : > { %v2927_v61 = vpop.eup %2926  ;;  %1619 = vmatmul.mubr.bf16.vlgmr.msra.gmra.mrb[32].mxu1 %v1438_v41 }
 0x386   : > { %v1391_v59 = vmul.f32 %v2927_v61, %v3628_v34  ;;  %v1390_v29 = vmul.f32 %v2927_v61, %v3626_v32 }
 0x387   : > { %v2929_v51 = vpop.eup %2928 }
 0x388   : > { %v1393_v1 = vmul.f32 %v2929_v51, %v3634_v49  ;;  %1423 = vst [vmem:[%s3331_s30 + $0xe8] sm:$0xff] %v1391_v59  ;;  %v1392_v0 = vmul.f32 %v2929_v51, %v3630_v4  ;;  %1422 = vst [vmem:[%s3331_s30 + $0xe0] sm:$0xff] %v1390_v29 }
 0x38a   : > { %1425 = vst [vmem:[%s3331_s30 + $0xf8] sm:$0xff] %v1393_v1  ;;  %v1441_v63 = vpack.c.bf16 %v1393_v1, %v1391_v59  ;;  %1424 = vst [vmem:[%s3331_s30 + $0xf0] sm:$0xff] %v1392_v0  ;;  %v1440_v56 = vpack.c.bf16 %v1392_v0, %v1390_v29  ;;  %v1637_v59 = vld [vmem:[#allocation2 + $0x10] sm:$0xff]  ;;  %v1635_v29 = vld [vmem:[#allocation2] sm:$0xff] }
 0x38b   : > { %v1638_v1 = vld [vmem:[#allocation2 + $0x18] sm:$0xff] }
 0x38c   : > { %1626 = vmatprep.mubr.bf16.mxu1 %v1441_v63 }
 0x38d   : > { %1627 = vmatmul.mubr.bf16.gmra.mrb[36].mxu1 %v1440_v56  ;;  %v1636_v56 = vld [vmem:[#allocation2 + $0x8] sm:$0xff] }
 0x42a   : > { %v2545_v42 = vpop.f32.mrb[16].mxu0 }
 0x42b   : > { %v2546_v34 = vpop.f32.mrb[17].mxu0 }
 0x42c   : > { %v2547_v3 = vadd.f32 %v2546_v34, %v2545_v42  ;;  %v2548_v32 = vpop.f32.mrb[18].mxu0 }
 0x42d   : > { %v2549_v43 = vpop.f32.mrb[19].mxu0 }
 0x42e   : > { %v2550_v2 = vadd.f32 %v2549_v43, %v2548_v32  ;;  %v1641_v43 = vld [vmem:[#allocation2 + $0x30] sm:$0xff] }
 0x430   : > { %v1651_v49 = vpack.c.bf16 %v2550_v2, %v2547_v3  ;;  %v1639_v2 = vld [vmem:[#allocation2 + $0x20] sm:$0xff] }
 0x432   : > { %v2551_v45 = vpop.f32.mrb[20].mxu0  ;;  %2639 = vmatprep.mubr.msk.bf16.mxu0 %vm952_vm0, %v1651_v49 }
 0x433   : > { %v2552_v4 = vpop.f32.mrb[21].mxu0 }
 0x434   : > { %v2553_v24 = vadd.f32 %v2552_v4, %v2551_v45  ;;  %v2554_v12 = vpop.f32.mrb[22].mxu0  ;;  %v1642_v45 = vld [vmem:[#allocation2 + $0x38] sm:$0xff] }
 0x435   : > { %v2555_v7 = vpop.f32.mrb[23].mxu0 }
 0x436   : > { %v2556_v46 = vadd.f32 %v2555_v7, %v2554_v12  ;;  %v1640_v12 = vld [vmem:[#allocation2 + $0x28] sm:$0xff] }
 0x438   : > { %v1652_v47 = vpack.c.bf16 %v2556_v46, %v2553_v24 }
 0x43a   : > { %v2557_v28 = vpop.f32.mrb[24].mxu0  ;;  %2640 = vmatmul.mubr.msk.bf16.vlgmr.msra.gmra.mrb[40].mxu0 %vm952_vm0, %v1652_v47 }
 0x43b   : > { %v2558_v53 = vpop.f32.mrb[25].mxu0 }
 0x43c   : > { %v2559_v14 = vadd.f32 %v2558_v53, %v2557_v28  ;;  %v2560_v15 = vpop.f32.mrb[26].mxu0 }
 0x43d   : > { %v2561_v60 = vpop.f32.mrb[27].mxu0 }
 0x43e   : > { %v2562_v18 = vadd.f32 %v2561_v60, %v2560_v15  ;;  %v1643_v15 = vld [vmem:[#allocation2 + $0x40] sm:$0xff] }
 0x440   : > { %v1653_v57 = vpack.c.bf16 %v2562_v18, %v2559_v14  ;;  %v1645_v14 = vld [vmem:[#allocation2 + $0x50] sm:$0xff]  ;;  %v1646_v18 = vld [vmem:[#allocation2 + $0x58] sm:$0xff] }
 0x442   : > { %v2563_v16 = vpop.f32.mrb[28].mxu0  ;;  %2643 = vmatprep.mubr.msk.bf16.mxu0 %vm952_vm0, %v1653_v57 }
 0x443   : > { %v2564_v62 = vpop.f32.mrb[29].mxu0 }
 0x444   : > { %v2565_v31 = vadd.f32 %v2564_v62, %v2563_v16  ;;  %v2566_v48 = vpop.f32.mrb[30].mxu0  ;;  %v1644_v62 = vld [vmem:[#allocation2 + $0x48] sm:$0xff] }
 0x445   : > { %v2567_v5 = vpop.f32.mrb[31].mxu0 }
 0x446   : > { %v2568_v25 = vadd.f32 %v2567_v5, %v2566_v48 }
 0x448   : > { %v1654_v44 = vpack.c.bf16 %v2568_v25, %v2565_v31 }
 0x44a   : > { %v2569_v6 = vpop.f32.mrb[32].mxu0  ;;  %2644 = vmatmul.mubr.msk.bf16.gmra.mrb[44].mxu0 %vm952_vm0, %v1654_v44 }
 0x44b   : > { %v2570_v30 = vpop.f32.mrb[33].mxu0 }
 0x44c   : > { %v2571_v8 = vadd.f32 %v2570_v30, %v2569_v6  ;;  %v2572_v26 = vpop.f32.mrb[34].mxu0  ;;  %v1649_v6 = vld [vmem:[#allocation2 + $0x70] sm:$0xff]  ;;  %v1647_v30 = vld [vmem:[#allocation2 + $0x60] sm:$0xff] }
 0x44d   : > { %v2573_v52 = vpop.f32.mrb[35].mxu0 }
 0x44e   : > { %v2574_v10 = vadd.f32 %v2573_v52, %v2572_v26  ;;  %v1650_v26 = vld [vmem:[#allocation2 + $0x78] sm:$0xff] }
 0x450   : > { %v1655_v36 = vpack.c.bf16 %v2574_v10, %v2571_v8 }
 0x452   : > { %v2575_v37 = vpop.f32.mrb[36].mxu0  ;;  %2647 = vmatprep.mubr.msk.bf16.mxu0 %vm952_vm0, %v1655_v36  ;;  %v1648_v36 = vld [vmem:[#allocation2 + $0x68] sm:$0xff] }
 0x453   : > { %v2576_v50 = vpop.f32.mrb[37].mxu0 }
 0x454   : > { %v2577_v9 = vadd.f32 %v2576_v50, %v2575_v37  ;;  %v2578_v13 = vpop.f32.mrb[38].mxu0 }
 0x455   : > { %v2579_v40 = vpop.f32.mrb[39].mxu0 }
 0x456   : > { %v2580_v38 = vadd.f32 %v2579_v40, %v2578_v13 }
 0x458   : > { %v1656_v11 = vpack.c.bf16 %v2580_v38, %v2577_v9  ;;  %v2581_v17 = vpop.f32.mrb[32].mxu1 }
 0x459   : > { %v2582_v21 = vpop.f32.mrb[33].mxu1 }
 0x45a   : > { %v2583_v23 = vadd.f32 %v2582_v21, %v2581_v17  ;;  %v2584_v20 = vpop.f32.mrb[34].mxu1  ;;  %2648 = vmatmul.mubr.msk.bf16.gmra.mrb[48].mxu0 %vm952_vm0, %v1656_v11  ;;  %v3722_v11 = vld [vmem:[%s4076_s7] ss:$0 sm:$0xff] (!%p2463_p8) }
 0x45b   : > { %v2585_v27 = vpop.f32.mrb[35].mxu1  ;;  %v1874_v17 = vld [vmem:[%s3317_s9] sm:$0xff] (!%p2463_p8) }
 0x45c   : > { %v2586_v33 = vadd.f32 %v2585_v27, %v2584_v20  ;;  %v1876_v20 = vld [vmem:[%s3317_s9 + $0x10] sm:$0xff] (!%p2463_p8) }
 0x45e   : > { %v1657_v19 = vpack.c.bf16 %v2586_v33, %v2583_v23 }
 0x460   : > { %v2587_v39 = vpop.f32.mrb[36].mxu1  ;;  %2651 = vmatprep.mubr.msk.bf16.mxu0 %vm952_vm0, %v1657_v19 }
 0x461   : > { %v2588_v54 = vpop.f32.mrb[37].mxu1 }
 0x462   : > { %v2589_v35 = vadd.f32 %v2588_v54, %v2587_v39  ;;  %v2590_v22 = vpop.f32.mrb[38].mxu1  ;;  %v1875_v39 = vld [vmem:[%s3317_s9 + $0x8] sm:$0xff] (!%p2463_p8) }
 0x463   : > { %v2591_v55 = vpop.f32.mrb[39].mxu1 }
 0x464   : > { %v2592_v41 = vadd.f32 %v2591_v55, %v2590_v22  ;;  %v1877_v55 = vld [vmem:[%s3317_s9 + $0x18] sm:$0xff] (!%p2463_p8) }
 0x466   : > { %v1658_v61 = vpack.c.bf16 %v2592_v41, %v2589_v35 }
 0x468   : > { %2652 = vmatmul.mubr.msk.bf16.gmra.mrb[52].mxu0 %vm952_vm0, %v1658_v61 }
 0x50d   : > { %v2641_v51 = vpop.f32.mrb[40].mxu0 }
 0x50e   : > { %v1801_v0 = vadd.f32 %v2641_v51, %v1637_v59  ;;  %v1736_v63 = vpop.f32.mrb[41].mxu0 }
 0x50f   : > { %v1799_v58 = vadd.f32 %v1736_v63, %v1635_v29  ;;  %v2642_v42 = vpop.f32.mrb[42].mxu0 }
 0x510   : > { %1817 = vst [vmem:[#allocation2 + $0x10] sm:$0xff] %v1801_v0  ;;  %v1802_v34 = vadd.f32 %v2642_v42, %v1638_v1  ;;  %v1739_v3 = vpop.f32.mrb[43].mxu0  ;;  %v1878_v0 = vld [vmem:[%s3317_s9 + $0x20] sm:$0xff] (!%p2463_p8) }
 0x511   : > { %1815 = vst [vmem:[#allocation2] sm:$0xff] %v1799_v58  ;;  %v1800_v32 = vadd.f32 %v1739_v3, %v1636_v56  ;;  %v1879_v58 = vld [vmem:[%s3317_s9 + $0x28] sm:$0xff] (!%p2463_p8) }
 0x512   : > { %1818 = vst [vmem:[#allocation2 + $0x18] sm:$0xff] %v1802_v34 }
 0x513   : > { %1816 = vst [vmem:[#allocation2 + $0x8] sm:$0xff] %v1800_v32 }
 0x517   : > { %v1837_v23 = vld [vmem:[#allocation2 + $0x10] sm:$0xff] (!%p2463_p8) }
 0x518   : > { %v1835_v38 = vld [vmem:[#allocation2] sm:$0xff] (!%p2463_p8)  ;;  %v1860_v33 = vadd.f32 (!%p2463_p8), %v3722_v11, %v1837_v23 }
 0x519   : > { %v1858_v21 = vadd.f32 (!%p2463_p8), %v3722_v11, %v1835_v38  ;;  %v1838_v54 = vld [vmem:[#allocation2 + $0x18] sm:$0xff] (!%p2463_p8) }
 0x51a   : > { %v1836_v27 = vld [vmem:[#allocation2 + $0x8] sm:$0xff] (!%p2463_p8)  ;;  %v1861_v22 = vadd.f32 (!%p2463_p8), %v3722_v11, %v1838_v54  ;;  %v3734_v59 = vadd.f32 (!%p2463_p8), %v1876_v20, %v1860_v33 }
 0x51b   : > { %v1859_v19 = vadd.f32 (!%p2463_p8), %v3722_v11, %v1836_v27  ;;  %v3730_v35 = vadd.f32 (!%p2463_p8), %v1874_v17, %v1858_v21 }
 0x51c   : > { %1910 = vadd.xlane.f32.xlu1 (!%p2463_p8), %v3734_v59  ;;  %v3741_v1 = vadd.f32 (!%p2463_p8), %v1877_v55, %v1861_v22 }
 0x51d   : > { %v2645_v49 = vpop.f32.mrb[44].mxu0  ;;  %1906 = vadd.xlane.f32.xlu0 (!%p2463_p8), %v3730_v35  ;;  %v3737_v29 = vadd.f32 (!%p2463_p8), %v1875_v39, %v1859_v19 }
 0x51e   : > { %v1805_v4 = vadd.f32 %v2645_v49, %v1641_v43  ;;  %v1752_v24 = vpop.f32.mrb[45].mxu0  ;;  %v1880_v43 = vld [vmem:[%s3317_s9 + $0x30] sm:$0xff] (!%p2463_p8) }
 0x51f   : > { %v1803_v7 = vadd.f32 %v1752_v24, %v1639_v2  ;;  %v2646_v46 = vpop.f32.mrb[46].mxu0 }
 0x520   : > { %1821 = vst [vmem:[#allocation2 + $0x30] sm:$0xff] %v1805_v4  ;;  %v1806_v47 = vadd.f32 %v2646_v46, %v1642_v45  ;;  %v1755_v28 = vpop.f32.mrb[47].mxu0  ;;  %1912 = vadd.xlane.f32.xlu1 (!%p2463_p8), %v3741_v1  ;;  %v1881_v45 = vld [vmem:[%s3317_s9 + $0x38] sm:$0xff] (!%p2463_p8)  ;;  %v1882_v46 = vld [vmem:[%s3317_s9 + $0x40] sm:$0xff] (!%p2463_p8) }
 0x521   : > { %1819 = vst [vmem:[#allocation2 + $0x20] sm:$0xff] %v1803_v7  ;;  %v1804_v53 = vadd.f32 %v1755_v28, %v1640_v12  ;;  %1908 = vadd.xlane.f32.xlu0 (!%p2463_p8), %v3737_v29 }
 0x522   : > { %1822 = vst [vmem:[#allocation2 + $0x38] sm:$0xff] %v1806_v47 }
 0x523   : > { %1820 = vst [vmem:[#allocation2 + $0x28] sm:$0xff] %v1804_v53  ;;  %v1883_v53 = vld [vmem:[%s3317_s9 + $0x48] sm:$0xff] (!%p2463_p8) }
 0x527   : > { %v1841_v56 = vld [vmem:[#allocation2 + $0x30] sm:$0xff] (!%p2463_p8) }
 0x528   : > { %v1839_v41 = vld [vmem:[#allocation2 + $0x20] sm:$0xff] (!%p2463_p8)  ;;  %v1864_v3 = vadd.f32 (!%p2463_p8), %v3722_v11, %v1841_v56 }
 0x529   : > { %v1862_v51 = vadd.f32 (!%p2463_p8), %v3722_v11, %v1839_v41  ;;  %v1842_v42 = vld [vmem:[#allocation2 + $0x38] sm:$0xff] (!%p2463_p8) }
 0x52a   : > { %v1840_v61 = vld [vmem:[#allocation2 + $0x28] sm:$0xff] (!%p2463_p8)  ;;  %v1865_v2 = vadd.f32 (!%p2463_p8), %v3722_v11, %v1842_v42  ;;  %v3757_v24 = vadd.f32 (!%p2463_p8), %v1880_v43, %v1864_v3 }
 0x52b   : > { %v1863_v63 = vadd.f32 (!%p2463_p8), %v3722_v11, %v1840_v61  ;;  %v3747_v34 = vadd.f32 (!%p2463_p8), %v1878_v0, %v1862_v51 }
 0x52c   : > { %v3761_v7 = vadd.f32 (!%p2463_p8), %v1881_v45, %v1865_v2 }
 0x52d   : > { %v2649_v60 = vpop.f32.mrb[48].mxu0  ;;  %v3751_v32 = vadd.f32 (!%p2463_p8), %v1879_v58, %v1863_v63  ;;  %1914 = vadd.xlane.f32.xlu0 (!%p2463_p8), %v3747_v34 }
 0x52e   : > { %v1809_v57 = vadd.f32 %v2649_v60, %v1645_v14  ;;  %v1768_v16 = vpop.f32.mrb[49].mxu0 }
 0x52f   : > { %v1807_v31 = vadd.f32 %v1768_v16, %v1643_v15  ;;  %v2650_v48 = vpop.f32.mrb[50].mxu0  ;;  %1916 = vadd.xlane.f32.xlu1 (!%p2463_p8), %v3751_v32 }
 0x530   : > { %1825 = vst [vmem:[#allocation2 + $0x50] sm:$0xff] %v1809_v57  ;;  %v1810_v5 = vadd.f32 %v2650_v48, %v1646_v18  ;;  %v1771_v25 = vpop.f32.mrb[51].mxu0  ;;  %v1884_v57 = vld [vmem:[%s3317_s9 + $0x50] sm:$0xff] (!%p2463_p8) }
 0x531   : > { %1823 = vst [vmem:[#allocation2 + $0x40] sm:$0xff] %v1807_v31  ;;  %v1808_v44 = vadd.f32 %v1771_v25, %v1644_v62  ;;  %1918 = vadd.xlane.f32.xlu0 (!%p2463_p8), %v3757_v24  ;;  %v1885_v31 = vld [vmem:[%s3317_s9 + $0x58] sm:$0xff] (!%p2463_p8) }
 0x532   : > { %1826 = vst [vmem:[#allocation2 + $0x58] sm:$0xff] %v1810_v5 }
 0x533   : > { %1824 = vst [vmem:[#allocation2 + $0x48] sm:$0xff] %v1808_v44  ;;  %1920 = vadd.xlane.f32.xlu1 (!%p2463_p8), %v3761_v7 }
 0x537   : > { %v1845_v28 = vld [vmem:[#allocation2 + $0x50] sm:$0xff] (!%p2463_p8) }
 0x538   : > { %v1843_v49 = vld [vmem:[#allocation2 + $0x40] sm:$0xff] (!%p2463_p8)  ;;  %v1868_v60 = vadd.f32 (!%p2463_p8), %v3722_v11, %v1845_v28 }
 0x539   : > { %v1866_v12 = vadd.f32 (!%p2463_p8), %v3722_v11, %v1843_v49  ;;  %v1846_v14 = vld [vmem:[#allocation2 + $0x58] sm:$0xff] (!%p2463_p8) }
 0x53a   : > { %v1844_v4 = vld [vmem:[#allocation2 + $0x48] sm:$0xff] (!%p2463_p8)  ;;  %v1869_v16 = vadd.f32 (!%p2463_p8), %v3722_v11, %v1846_v14  ;;  %v3777_v5 = vadd.f32 (!%p2463_p8), %v1884_v57, %v1868_v60 }
 0x53b   : > { %v2653_v8 = vpop.f32.mrb[52].mxu0  ;;  %1834 = sbr.rel (%p2463_p8) target bundleno = 1673 (0x689), region = 68  ;;  %v1867_v47 = vadd.f32 (!%p2463_p8), %v3722_v11, %v1844_v4  ;;  %v3767_v15 = vadd.f32 (!%p2463_p8), %v1882_v46, %v1866_v12 }
 0x53c   : > { %v1813_v52 = vadd.f32 %v2653_v8, %v1649_v6  ;;  %v1784_v10 = vpop.f32.mrb[53].mxu0  ;;  %v3781_v44 = vadd.f32 (!%p2463_p8), %v1885_v31, %v1869_v16  ;;  %v1886_v6 = vld [vmem:[%s3317_s9 + $0x60] sm:$0xff] (!%p2463_p8) }
 0x53d   : > { %v1811_v37 = vadd.f32 %v1784_v10, %v1647_v30  ;;  %v2654_v50 = vpop.f32.mrb[54].mxu0  ;;  %v3771_v18 = vadd.f32 (!%p2463_p8), %v1883_v53, %v1867_v47  ;;  %1922 = vadd.xlane.f32.xlu0 (!%p2463_p8), %v3767_v15 }
 0x53e   : > { %1829 = vst [vmem:[#allocation2 + $0x70] sm:$0xff] %v1813_v52  ;;  %v1814_v9 = vadd.f32 %v2654_v50, %v1650_v26  ;;  %v1787_v13 = vpop.f32.mrb[55].mxu0  ;;  %v1887_v26 = vld [vmem:[%s3317_s9 + $0x68] sm:$0xff] (!%p2463_p8)  ;;  %v1888_v50 = vld [vmem:[%s3317_s9 + $0x70] sm:$0xff] (!%p2463_p8) }
 0x53f   : > { %1827 = vst [vmem:[#allocation2 + $0x60] sm:$0xff] %v1811_v37  ;;  %v1812_v40 = vadd.f32 %v1787_v13, %v1648_v36  ;;  %1924 = vadd.xlane.f32.xlu1 (!%p2463_p8), %v3771_v18  ;;  %v1889_v13 = vld [vmem:[%s3317_s9 + $0x78] sm:$0xff] (!%p2463_p8) }
 0x540   : > { %1830 = vst [vmem:[#allocation2 + $0x78] sm:$0xff] %v1814_v9 }
 0x541   : > { %1828 = vst [vmem:[#allocation2 + $0x68] sm:$0xff] %v1812_v40  ;;  %1926 = vadd.xlane.f32.xlu0 (!%p2463_p8), %v3777_v5 }
 0x543   : > { %1928 = vadd.xlane.f32.xlu1 %v3781_v44 }
 0x545   : > { %v1849_v8 = vld [vmem:[#allocation2 + $0x70] sm:$0xff] }
 0x546   : > { %v1847_v62 = vld [vmem:[#allocation2 + $0x60] sm:$0xff]  ;;  %v1872_v36 = vadd.f32 %v3722_v11, %v1849_v8 }
 0x547   : > { %v1870_v25 = vadd.f32 %v3722_v11, %v1847_v62  ;;  %v1850_v52 = vld [vmem:[#allocation2 + $0x78] sm:$0xff] }
 0x548   : > { %v1848_v48 = vld [vmem:[#allocation2 + $0x68] sm:$0xff]  ;;  %v1873_v9 = vadd.f32 %v3722_v11, %v1850_v52  ;;  %v3797_v40 = vadd.f32 %v1888_v50, %v1872_v36 }
 0x549   : > { %v1871_v30 = vadd.f32 %v3722_v11, %v1848_v48  ;;  %v3787_v10 = vadd.f32 %v1886_v6, %v1870_v25 }
 0x54a   : > { %v3800_v38 = vadd.f32 %v1889_v13, %v1873_v9 }
 0x54b   : > { %v3791_v37 = vadd.f32 %v1887_v26, %v1871_v30  ;;  %1930 = vadd.xlane.f32.xlu0 %v3787_v10 }
 0x54d   : > { %1932 = vadd.xlane.f32.xlu1 %v3791_v37 }
 0x54f   : > { %1934 = vadd.xlane.f32.xlu0 %v3797_v40 }
 0x551   : > { %1936 = vadd.xlane.f32.xlu1 %v3800_v38 }
 0x5a9   : > { %v1911_v23 = vpop.xlane.xlu1 %1910 }
 0x5aa   : > { %v1907_v17 = vpop.xlane.xlu0 %1906  ;;  %v1941_v20 = vmul.f32 0.0078125, %v1911_v23 }
 0x5ab   : > { %v1939_v21 = vmul.f32 0.0078125, %v1907_v17 }
 0x5ac   : > { %v3808_v11 = vsub.f32 %v3734_v59, %v1941_v20 }
 0x5ad   : > { %v3805_v27 = vsub.f32 %v3730_v35, %v1939_v21  ;;  %v1913_v54 = vpop.xlane.xlu1 %1912 }
 0x5ae   : > { %v1909_v33 = vpop.xlane.xlu0 %1908  ;;  %v1942_v22 = vmul.f32 0.0078125, %v1913_v54  ;;  %v1973_v41 = vmul.f32 %v3808_v11, %v3808_v11 }
 0x5af   : > { %v1940_v19 = vmul.f32 0.0078125, %v1909_v33  ;;  %v1971_v39 = vmul.f32 %v3805_v27, %v3805_v27 }
 0x5b0   : > { %v3818_v35 = vsub.f32 %v3741_v1, %v1942_v22 }
 0x5b1   : > { %v3813_v55 = vsub.f32 %v3737_v29, %v1940_v19  ;;  %1987 = vadd.xlane.f32.xlu0 %v1971_v39 }
 0x5b2   : > { %v1974_v29 = vmul.f32 %v3818_v35, %v3818_v35 }
 0x5b3   : > { %v1972_v51 = vmul.f32 %v3813_v55, %v3813_v55 }
 0x5b5   : > { %1991 = vadd.xlane.f32.xlu0 %v1973_v41  ;;  %1989 = vadd.xlane.f32.xlu1 %v1972_v51 }
 0x5b9   : > { %1993 = vadd.xlane.f32.xlu1 %v1974_v29 }
 0x5ba   : > { %v1915_v61 = vpop.xlane.xlu0 %1914 }
 0x5bb   : > { %v1943_v59 = vmul.f32 0.0078125, %v1915_v61 }
 0x5bc   : > { %v1917_v0 = vpop.xlane.xlu1 %1916 }
 0x5bd   : > { %v1944_v63 = vmul.f32 0.0078125, %v1917_v0  ;;  %v3823_v56 = vsub.f32 %v3747_v34, %v1943_v59 }
 0x5be   : > { %v1919_v1 = vpop.xlane.xlu0 %1918 }
 0x5bf   : > { %v3828_v58 = vsub.f32 %v3751_v32, %v1944_v63  ;;  %v1945_v42 = vmul.f32 0.0078125, %v1919_v1  ;;  %v1975_v3 = vmul.f32 %v3823_v56, %v3823_v56 }
 0x5c0   : > { %v1921_v43 = vpop.xlane.xlu1 %1920 }
 0x5c1   : > { %v1946_v2 = vmul.f32 0.0078125, %v1921_v43  ;;  %v3833_v49 = vsub.f32 %v3757_v24, %v1945_v42  ;;  %1995 = vadd.xlane.f32.xlu0 %v1975_v3  ;;  %v1976_v34 = vmul.f32 %v3828_v58, %v3828_v58 }
 0x5c3   : > { %v3838_v45 = vsub.f32 %v3761_v7, %v1946_v2  ;;  %v1977_v12 = vmul.f32 %v3833_v49, %v3833_v49  ;;  %1997 = vadd.xlane.f32.xlu1 %v1976_v34  ;;  %v3887_v2 = vld [vmem:[%s4077_s8] ss:$0 sm:$0xff] }
 0x5c5   : > { %1999 = vadd.xlane.f32.xlu0 %v1977_v12  ;;  %v1978_v24 = vmul.f32 %v3838_v45, %v3838_v45 }
 0x5c7   : > { %2001 = vadd.xlane.f32.xlu1 %v1978_v24 }
 0x5ca   : > { %v1923_v32 = vpop.xlane.xlu0 %1922 }
 0x5cb   : > { %v1947_v4 = vmul.f32 0.0078125, %v1923_v32 }
 0x5cc   : > { %v1925_v46 = vpop.xlane.xlu1 %1924 }
 0x5cd   : > { %v1948_v47 = vmul.f32 0.0078125, %v1925_v46  ;;  %v3843_v28 = vsub.f32 %v3767_v15, %v1947_v4 }
 0x5ce   : > { %v1927_v7 = vpop.xlane.xlu0 %1926 }
 0x5cf   : > { %v3848_v53 = vsub.f32 %v3771_v18, %v1948_v47  ;;  %v1949_v14 = vmul.f32 0.0078125, %v1927_v7  ;;  %v1979_v60 = vmul.f32 %v3843_v28, %v3843_v28  ;;  %v3893_v47 = vld [vmem:[%s4131_s16] ss:$0 sm:$0xff] }
 0x5d0   : > { %v1929_v57 = vpop.xlane.xlu1 %1928 }
 0x5d1   : > { %v1950_v16 = vmul.f32 0.0078125, %v1929_v57  ;;  %v3853_v62 = vsub.f32 %v3777_v5, %v1949_v14  ;;  %2003 = vadd.xlane.f32.xlu0 %v1979_v60  ;;  %v1980_v15 = vmul.f32 %v3848_v53, %v3848_v53 }
 0x5d3   : > { %v3858_v31 = vsub.f32 %v3781_v44, %v1950_v16  ;;  %v1981_v25 = vmul.f32 %v3853_v62, %v3853_v62  ;;  %2005 = vadd.xlane.f32.xlu1 %v1980_v15 }
 0x5d5   : > { %2007 = vadd.xlane.f32.xlu0 %v1981_v25  ;;  %v1982_v5 = vmul.f32 %v3858_v31, %v3858_v31 }
 0x5d7   : > { %2009 = vadd.xlane.f32.xlu1 %v1982_v5 }
 0x5d8   : > { %v1931_v18 = vpop.xlane.xlu0 %1930 }
 0x5d9   : > { %v1951_v48 = vmul.f32 0.0078125, %v1931_v18 }
 0x5da   : > { %v1933_v6 = vpop.xlane.xlu1 %1932 }
 0x5db   : > { %v1952_v30 = vmul.f32 0.0078125, %v1933_v6  ;;  %v3863_v8 = vsub.f32 %v3787_v10, %v1951_v48 }
 0x5dc   : > { %v1935_v44 = vpop.xlane.xlu0 %1934 }
 0x5dd   : > { %v3868_v26 = vsub.f32 %v3791_v37, %v1952_v30  ;;  %v1953_v52 = vmul.f32 0.0078125, %v1935_v44  ;;  %v1983_v36 = vmul.f32 %v3863_v8, %v3863_v8 }
 0x5de   : > { %v1937_v50 = vpop.xlane.xlu1 %1936 }
 0x5df   : > { %v1954_v9 = vmul.f32 0.0078125, %v1937_v50  ;;  %v3873_v13 = vsub.f32 %v3797_v40, %v1953_v52  ;;  %2011 = vadd.xlane.f32.xlu0 %v1983_v36  ;;  %v1984_v10 = vmul.f32 %v3868_v26, %v3868_v26 }
 0x5e1   : > { %v3878_v17 = vsub.f32 %v3800_v38, %v1954_v9  ;;  %v1985_v37 = vmul.f32 %v3873_v13, %v3873_v13  ;;  %2013 = vadd.xlane.f32.xlu1 %v1984_v10 }
 0x5e3   : > { %2015 = vadd.xlane.f32.xlu0 %v1985_v37  ;;  %v1986_v21 = vmul.f32 %v3878_v17, %v3878_v17 }
 0x5e5   : > { %2017 = vadd.xlane.f32.xlu1 %v1986_v21 }
 0x63e   : > { %v1988_v23 = vpop.xlane.xlu0 %1987 }
 0x63f   : > { %v2019_v40 = vmul.f32 0.0078125, %v1988_v23 }
 0x641   : > { %v2035_v20 = vadd.f32 1e-05, %v2019_v40 }
 0x642   : > { %v1990_v33 = vpop.xlane.xlu1 %1989  ;;  %v1992_v19 = vpop.xlane.xlu0 %1991 }
 0x643   : > { %2930 = vrsqrt.f32 %v2035_v20  ;;  %v2020_v39 = vmul.f32 0.0078125, %v1990_v33  ;;  %v2021_v54 = vmul.f32 0.0078125, %v1992_v19 }
 0x645   : > { %v2036_v22 = vadd.f32 1e-05, %v2020_v39  ;;  %v2037_v38 = vadd.f32 1e-05, %v2021_v54 }
 0x646   : > { %v1994_v41 = vpop.xlane.xlu1 %1993 }
 0x647   : > { %2932 = vrsqrt.f32 %v2036_v22  ;;  %v2022_v59 = vmul.f32 0.0078125, %v1994_v41 }
 0x648   : > { %2934 = vrsqrt.f32 %v2037_v38 }
 0x649   : > { %v2038_v0 = vadd.f32 1e-05, %v2022_v59 }
 0x64b   : > { %2936 = vrsqrt.f32 %v2038_v0 }
 0x64d   : > { %v2931_v43 = vpop.eup %2930 }
 0x64e   : > { %v1996_v61 = vpop.xlane.xlu0 %1995  ;;  %v2067_v4 = vmul.f32 %v2931_v43, %v3805_v27 }
 0x64f   : > { %v2023_v51 = vmul.f32 0.0078125, %v1996_v61 }
 0x650   : > { %v1998_v29 = vpop.xlane.xlu1 %1997  ;;  %v2090_v14 = vmul.f32 %v3887_v2, %v2067_v4 }
 0x651   : > { %v2039_v63 = vadd.f32 1e-05, %v2023_v51  ;;  %v2024_v42 = vmul.f32 0.0078125, %v1998_v29  ;;  %v2933_v60 = vpop.eup %2932 }
 0x652   : > { %v2000_v1 = vpop.xlane.xlu0 %1999  ;;  %v2935_v15 = vpop.eup %2934  ;;  %v2113_v27 = vadd.f32 %v3893_v47, %v2090_v14  ;;  %v2068_v18 = vmul.f32 %v2933_v60, %v3813_v55 }
 0x653   : > { %v2025_v3 = vmul.f32 0.0078125, %v2000_v1  ;;  %2938 = vrsqrt.f32 %v2039_v63  ;;  %v2040_v34 = vadd.f32 1e-05, %v2024_v42  ;;  %v2069_v6 = vmul.f32 %v2935_v15, %v3808_v11 }
 0x654   : > { %v2002_v12 = vpop.xlane.xlu1 %2001  ;;  %2129 = vst [vmem:[%s3329_s26] sm:$0xff] %v2113_v27  ;;  %v2091_v44 = vmul.f32 %v3887_v2, %v2068_v18 }
 0x655   : > { %v2041_v32 = vadd.f32 1e-05, %v2025_v3  ;;  %2940 = vrsqrt.f32 %v2040_v34  ;;  %v2026_v24 = vmul.f32 0.0078125, %v2002_v12  ;;  %v2937_v52 = vpop.eup %2936  ;;  %v2092_v36 = vmul.f32 %v3887_v2, %v2069_v6 }
 0x656   : > { %v2114_v55 = vadd.f32 %v3893_v47, %v2091_v44  ;;  %v2070_v37 = vmul.f32 %v2937_v52, %v3818_v35 }
 0x657   : > { %2942 = vrsqrt.f32 %v2041_v32  ;;  %v2042_v57 = vadd.f32 1e-05, %v2026_v24  ;;  %v2115_v23 = vadd.f32 %v3893_v47, %v2092_v36 }
 0x658   : > { %2130 = vst [vmem:[%s3329_s26 + $0x8] sm:$0xff] %v2114_v55  ;;  %v2093_v33 = vmul.f32 %v3887_v2, %v2070_v37 }
 0x659   : > { %2944 = vrsqrt.f32 %v2042_v57  ;;  %2131 = vst [vmem:[%s3329_s26 + $0x10] sm:$0xff] %v2115_v23 }
 0x65a   : > { %v2116_v38 = vadd.f32 %v3893_v47, %v2093_v33 }
 0x65c   : > { %2132 = vst [vmem:[%s3329_s26 + $0x18] sm:$0xff] %v2116_v38 }
 0x65d   : > { %v2939_v10 = vpop.eup %2938 }
 0x65e   : > { %v2004_v46 = vpop.xlane.xlu0 %2003  ;;  %v2071_v40 = vmul.f32 %v2939_v10, %v3823_v56 }
 0x65f   : > { %v2027_v7 = vmul.f32 0.0078125, %v2004_v46  ;;  %v2941_v39 = vpop.eup %2940 }
 0x660   : > { %v2006_v48 = vpop.xlane.xlu1 %2005  ;;  %v2094_v54 = vmul.f32 %v3887_v2, %v2071_v40  ;;  %v2072_v41 = vmul.f32 %v2941_v39, %v3828_v58 }
 0x661   : > { %v2043_v16 = vadd.f32 1e-05, %v2027_v7  ;;  %v2028_v30 = vmul.f32 0.0078125, %v2006_v48  ;;  %v2943_v35 = vpop.eup %2942 }
 0x662   : > { %v2008_v25 = vpop.xlane.xlu0 %2007  ;;  %v2117_v51 = vadd.f32 %v3893_v47, %v2094_v54  ;;  %v2073_v0 = vmul.f32 %v2943_v35, %v3833_v49  ;;  %v2095_v29 = vmul.f32 %v3887_v2, %v2072_v41 }
 0x663   : > { %v2029_v5 = vmul.f32 0.0078125, %v2008_v25  ;;  %2946 = vrsqrt.f32 %v2043_v16  ;;  %v2044_v50 = vadd.f32 1e-05, %v2028_v30  ;;  %v2945_v42 = vpop.eup %2944 }
 0x664   : > { %v2010_v11 = vpop.xlane.xlu1 %2009  ;;  %2133 = vst [vmem:[%s3329_s26 + $0x20] sm:$0xff] %v2117_v51  ;;  %v2096_v58 = vmul.f32 %v3887_v2, %v2073_v0  ;;  %v2118_v34 = vadd.f32 %v3893_v47, %v2095_v29  ;;  %v2074_v32 = vmul.f32 %v2945_v42, %v3838_v45 }
 0x665   : > { %v2045_v9 = vadd.f32 1e-05, %v2029_v5  ;;  %2948 = vrsqrt.f32 %v2044_v50  ;;  %v2030_v20 = vmul.f32 0.0078125, %v2010_v11 }
 0x666   : > { %v2119_v12 = vadd.f32 %v3893_v47, %v2096_v58  ;;  %2134 = vst [vmem:[%s3329_s26 + $0x28] sm:$0xff] %v2118_v34  ;;  %v2097_v7 = vmul.f32 %v3887_v2, %v2074_v32 }
 0x667   : > { %2950 = vrsqrt.f32 %v2045_v9  ;;  %v2046_v22 = vadd.f32 1e-05, %v2030_v20 }
 0x668   : > { %2135 = vst [vmem:[%s3329_s26 + $0x30] sm:$0xff] %v2119_v12  ;;  %v2120_v16 = vadd.f32 %v3893_v47, %v2097_v7 }
 0x669   : > { %2952 = vrsqrt.f32 %v2046_v22 }
 0x66a   : > { %2136 = vst [vmem:[%s3329_s26 + $0x38] sm:$0xff] %v2120_v16 }
 0x66c   : > { %v2012_v21 = vpop.xlane.xlu0 %2011 }
 0x66d   : > { %v2031_v19 = vmul.f32 0.0078125, %v2012_v21  ;;  %v2947_v43 = vpop.eup %2946 }
 0x66e   : > { %v2014_v61 = vpop.xlane.xlu1 %2013  ;;  %v2075_v46 = vmul.f32 %v2947_v43, %v3843_v28 }
 0x66f   : > { %v2047_v56 = vadd.f32 1e-05, %v2031_v19  ;;  %v2032_v63 = vmul.f32 0.0078125, %v2014_v61  ;;  %v2949_v14 = vpop.eup %2948 }
 0x670   : > { %v2016_v59 = vpop.xlane.xlu0 %2015  ;;  %v2098_v60 = vmul.f32 %v3887_v2, %v2075_v46  ;;  %v2076_v15 = vmul.f32 %v2949_v14, %v3848_v53 }
 0x671   : > { %2954 = vrsqrt.f32 %v2047_v56  ;;  %v2033_v1 = vmul.f32 0.0078125, %v2016_v59  ;;  %v2048_v3 = vadd.f32 1e-05, %v2032_v63  ;;  %v2951_v45 = vpop.eup %2950 }
 0x672   : > { %v2018_v4 = vpop.xlane.xlu1 %2017  ;;  %v2121_v28 = vadd.f32 %v3893_v47, %v2098_v60  ;;  %v2077_v27 = vmul.f32 %v2951_v45, %v3853_v62  ;;  %v2099_v18 = vmul.f32 %v3887_v2, %v2076_v15 }
 0x673   : > { %v2049_v49 = vadd.f32 1e-05, %v2033_v1  ;;  %2956 = vrsqrt.f32 %v2048_v3  ;;  %v2034_v24 = vmul.f32 0.0078125, %v2018_v4  ;;  %v2953_v48 = vpop.eup %2952 }
 0x674   : > { %2137 = vst [vmem:[%s3329_s26 + $0x40] sm:$0xff] %v2121_v28  ;;  %v2100_v25 = vmul.f32 %v3887_v2, %v2077_v27  ;;  %v2122_v30 = vadd.f32 %v3893_v47, %v2099_v18  ;;  %v2078_v5 = vmul.f32 %v2953_v48, %v3858_v31 }
 0x675   : > { %2958 = vrsqrt.f32 %v2049_v49  ;;  %v2050_v57 = vadd.f32 1e-05, %v2034_v24 }
 0x676   : > { %v2123_v53 = vadd.f32 %v3893_v47, %v2100_v25  ;;  %2138 = vst [vmem:[%s3329_s26 + $0x48] sm:$0xff] %v2122_v30  ;;  %v2101_v62 = vmul.f32 %v3887_v2, %v2078_v5 }
 0x677   : > { %2960 = vrsqrt.f32 %v2050_v57 }
 0x678   : > { %2139 = vst [vmem:[%s3329_s26 + $0x50] sm:$0xff] %v2123_v53  ;;  %v2124_v9 = vadd.f32 %v3893_v47, %v2101_v62 }
 0x67a   : > { %2140 = vst [vmem:[%s3329_s26 + $0x58] sm:$0xff] %v2124_v9 }
 0x67b   : > { %v2955_v6 = vpop.eup %2954 }
 0x67c   : > { %v2079_v44 = vmul.f32 %v2955_v6, %v3863_v8 }
 0x67d   : > { %v2957_v52 = vpop.eup %2956 }
 0x67e   : > { %v2102_v36 = vmul.f32 %v3887_v2, %v2079_v44  ;;  %v2080_v31 = vmul.f32 %v2957_v52, %v3868_v26 }
 0x67f   : > { %v2959_v50 = vpop.eup %2958 }
 0x680   : > { %v2125_v10 = vadd.f32 %v3893_v47, %v2102_v36  ;;  %v2081_v55 = vmul.f32 %v2959_v50, %v3873_v13  ;;  %v2103_v8 = vmul.f32 %v3887_v2, %v2080_v31 }
 0x681   : > { %v2961_v37 = vpop.eup %2960 }
 0x682   : > { %2141 = vst [vmem:[%s3329_s26 + $0x60] sm:$0xff] %v2125_v10  ;;  %v2104_v11 = vmul.f32 %v3887_v2, %v2081_v55  ;;  %v2126_v21 = vadd.f32 %v3893_v47, %v2103_v8  ;;  %v2082_v23 = vmul.f32 %v2961_v37, %v3878_v17 }
 0x684   : > { %v2127_v40 = vadd.f32 %v3893_v47, %v2104_v11  ;;  %2142 = vst [vmem:[%s3329_s26 + $0x68] sm:$0xff] %v2126_v21  ;;  %v2105_v26 = vmul.f32 %v3887_v2, %v2082_v23 }
 0x686   : > { %2143 = vst [vmem:[%s3329_s26 + $0x70] sm:$0xff] %v2127_v40  ;;  %v2128_v20 = vadd.f32 %v3893_v47, %v2105_v26 }
 0x688   : > { %2144 = vst [vmem:[%s3329_s26 + $0x78] sm:$0xff] %v2128_v20 }
 0x689 PF: > { %s4132_s10 = sld [smem:[#allocation13_spill]]  ;;  %s2480_s18 = sshll.u32 %s3100_s24, 11 }
 0x68a   : > { %s4134_s22 = sld [smem:[#allocation28_spill]]  ;;  %s2166_s21 = sshll.u32 %s3329_s26, 4  ;;  %s3965_s21 = int_to_ptr.vmem [resolvable:$true] %s2166_s21 }
 0x68b   : > { %s2962_s11 = scalar_lea.vmem %s3965_s21, 2048  ;;  %s3115_s13 = smov [#allocation3]  }
 0x68c   : > { %p2963_p9 = scmp.ne.s32.totalorder %s3965_s21, %s2962_s11  ;;  %s2966_s9 = sshll.u32 %s3115_s13, 4  ;;  %s2967_s9 = int_to_ptr.vmem [resolvable:$false] %s2966_s9 }
 0x68d   : > { %s2968_s14 = scalar_lea.vmem %s2967_s9, 4096  ;;  %p2969_p0 = scmp.lt.s32.totalorder %s3965_s21, %s2967_s9 }
 0x68e   : > { %p2964_p10 = pnand %p2963_p9, %p3252_p3  ;;  %p2970_p1 = scmp.lt.s32.totalorder %s2968_s14, %s2962_s11 }
 0x68f   : > { %s4136_s15 = sand.u32 1, %s4132_s10  }
 0x690   : > { %s4135_s12 = smov %s4134_s22  ;;  %s3962_s27 = scalar_lea.hbm %s4134_s22, %s2480_s18 }
 0x691   : > { %s3969_s20 = scalar_lea.sflag [#allocation4], %s4136_s15  ;;  %p2965_p11 = pneg %p2964_p10 }
 0x692   : > { %p2971_p4 = por %p2970_p1, %p2969_p0 }
 0x694   : > { %p2972_p2 = pnand %p2971_p4, %p2965_p11 }
 0x696   : > { %2975 = shalt.err (!%p2972_p2)
}
 0x697   : > { %s2976_s26 = scalar_lea.hbm %s3962_s27, 2048  ;;  %s2980_s16 = scalar_lea.hbm %s4135_s12, 4096 }
 0x698   : > { %p2977_p5 = scmp.ne.s32.totalorder %s3962_s27, %s2976_s26  ;;  %p2981_p9 = scmp.lt.u32.totalorder %s3962_s27, %s4135_s12 }
 0x699   : > { %p2982_p10 = scmp.lt.u32.totalorder %s2980_s16, %s2976_s26  ;;  %p2984_p0 = scmp.lt.u32.totalorder %s2976_s26, %s3962_s27 }
 0x69a   : > { %p2978_p6 = pnand %p2977_p5, %p3252_p3 }
 0x69b   : > { %p2983_p11 = por %p2982_p10, %p2981_p9 }
 0x69c   : > { %p2979_p8 = pneg %p2978_p6 }
 0x69d   : > { %p2985_p1 = por %p2984_p0, %p2983_p11 }
 0x69f   : > { %p2986_p4 = pnand %p2985_p1, %p2979_p8 }
 0x6a1   : > { %2989 = shalt.err (!%p2986_p4)
}
 0x6a2   : > { %s3116_s19 = smov 128   ;;  %s4137_s25 = sld [smem:[#allocation10_spill]] }
 0x6a3   : > { %s3117_s15 = smov 8   ;;  %s2471_s11 = sshll.u32 %s3096_s23, 5 }
 0x6a4   : > { %2679 = dma.vmem_to_hbm [thread:$0]  (%p3252_p3), %s3965_s21, 2048, %s3962_s27, %s3969_s20, %s3116_s19, %s3116_s19, %s3117_s15  }
 0x6a5   : > { %s2472_s13 = sshll.u32 %s3100_s24, 7  ;;  %s2187_s14 = sshll.u32 %s3331_s30, 4  ;;  %s3996_s14 = int_to_ptr.vmem [resolvable:$true] %s2187_s14 }
 0x6a6   : > { %s2184_s9 = sadd.s32 %s2472_s13, %s2471_s11  ;;  %s4139_s16 = sld [smem:[#allocation29_spill]] }
 0x6a7   : > { %s2473_s26 = sshll.u32 %s2184_s9, 7  ;;  %s2990_s17 = scalar_lea.vmem %s3996_s14, 4096 }
 0x6a8   : > { %s4140_s18 = sand.u32 1, %s4137_s25   ;;  %p2991_p3 = scmp.ne.s32.totalorder %s3996_s14, %s2990_s17 }
 0x6a9   : > { %s4005_s0 = scalar_lea.sflag [#allocation6], %s4140_s18  ;;  %s3118_s23 = smov [#allocation5]  }
 0x6aa   : > { %p2992_p2 = pnand %p2991_p3, %p3281_p12  ;;  %s2994_s24 = sshll.u32 %s3118_s23, 4  ;;  %s2995_s24 = int_to_ptr.vmem [resolvable:$false] %s2994_s24 }
 0x6ab   : > { %s2996_s30 = scalar_lea.vmem %s2995_s24, 8192  ;;  %p2997_p6 = scmp.lt.s32.totalorder %s3996_s14, %s2995_s24 }
 0x6ac   : > { %s4001_s10 = scalar_lea.hbm %s4139_s16, %s2473_s26  ;;  %p2993_p5 = pneg %p2992_p2 }
 0x6ad   : > { %p2998_p8 = scmp.lt.s32.totalorder %s2996_s30, %s2990_s17 }
 0x6af   : > { %p2999_p9 = por %p2998_p8, %p2997_p6 }
 0x6b1   : > { %p3000_p10 = pnand %p2999_p9, %p2993_p5 }
 0x6b3   : > { %3003 = shalt.err (!%p3000_p10)
}
 0x6b4   : > { %s3004_s27 = scalar_lea.hbm %s4001_s10, 4096  ;;  %s3008_s19 = scalar_lea.hbm %s4139_s16, 32768 }
 0x6b5   : > { %p3005_p11 = scmp.ne.s32.totalorder %s4001_s10, %s3004_s27  ;;  %p3009_p4 = scmp.lt.u32.totalorder %s4001_s10, %s4139_s16 }
 0x6b6   : > { %p3010_p3 = scmp.lt.u32.totalorder %s3008_s19, %s3004_s27  ;;  %p3012_p5 = scmp.lt.u32.totalorder %s3004_s27, %s4001_s10 }
 0x6b7   : > { %p3006_p0 = pnand %p3005_p11, %p3281_p12 }
 0x6b8   : > { %p3011_p2 = por %p3010_p3, %p3009_p4 }
 0x6b9   : > { %p3007_p1 = pneg %p3006_p0 }
 0x6ba   : > { %p3013_p6 = por %p3012_p5, %p3011_p2 }
 0x6bc   : > { %p3014_p8 = pnand %p3013_p6, %p3007_p1 }
 0x6be   : > { %3017 = shalt.err (!%p3014_p8)
}
 0x6bf   : > { %s3119_s11 = smov 256   ;;  %s3120_s13 = smov 16  }
 0x6c0   : > { %2680 = dma.vmem_to_hbm [thread:$0]  (%p3281_p12), %s3996_s14, 4096, %s4001_s10, %s4005_s0, %s3119_s11, %s3119_s11, %s3120_s13  }
 0x6c1 PF: > { %s4141_s9 = sld [smem:[#allocation17_spill]]  ;;  %s4142_s26 = sld [smem:[#allocation12_spill]] }
 0x6c7   : > { %p2690_p9 = scmp.ge.s32.totalorder %s4141_s9, 2  ;;  %s2202_s29 = sand.u32 1, %s4142_s26  }
 0x6c8   : > { %s2203_s18 = scalar_lea.sflag [#allocation4], %s2202_s29 }
 0x6c9   : > { %p2684_p10 = pnand %p2690_p9, %p3269_p7 }
 0x6cb   : > { %3063 = dma.done.wait (!%p2684_p10), %s2203_s18, 2048  }
 0x6cc   : > { %3065 = vsyncadd (!%p2684_p10), %s2203_s18, 4294965248  ;;  %s4144_s17 = sld [smem:[#allocation9_spill]]  ;;  %p2687_p11 = pnand %p2690_p9, %p3293_p13 }
 0x6d2   : > { %s2211_s24 = sand.u32 1, %s4144_s17  }
 0x6d3   : > { %s2212_s30 = scalar_lea.sflag [#allocation6], %s2211_s24 }
 0x6d4   : > { %3067 = dma.done.wait (!%p2687_p11), %s2212_s30, 4096  }
 0x6d5   : > { %3069 = vsyncadd (!%p2687_p11), %s2212_s30, 4294963200  ;;  %s28_s27 = sadd.s32 1, %s4141_s9   ;;  %s4146_s17 = sld [smem:[#allocation10_spill]] }
 0x6d6   : > { %p25_p12 = scmp.ge.s32.totalorder %s28_s27, 10   ;;  %s4147_s18 = sld [smem:[#allocation11_spill]] }
 0x6d7   : > { %s4148_s19 = sld [smem:[#allocation24_spill]]  ;;  %s4149_s20 = sld [smem:[#allocation13_spill]] }
 0x6d8   : > { %s4150_s21 = sld [smem:[#allocation14_spill]]  ;;  %s4151_s22 = sld [smem:[#allocation23_spill]] }
 0x6d9   : > { %s4152_s23 = sld [smem:[#allocation15_spill]]  ;;  %s4153_s24 = sld [smem:[#allocation16_spill]] }
 0x6da   : > { %s4154_s25 = sld [smem:[#allocation18_spill]]  ;;  %s4155_s26 = sld [smem:[#allocation20_spill]] }
 0x6db   :  { %27 = sbr.rel (!%p25_p12) target bundleno = 14 (0xe), region = 132 }
 0x6e2   :  { %2217 = vsyncpa [#allocation4], 1 }
 0x6e3   :  { %2219 = vsyncpa [#allocation4 + $0x1], 1 }
 0x6e4   :  { %2220 = vsyncpa [#allocation6], 1 }
 0x6e5   :  { %2222 = vsyncpa [#allocation6 + $0x1], 1 }

</bundles_post_ra>
